<compile_context>
chip_gen: v5e
topology: v5e:2x2
jax: 0.10.0
libtpu: 0.0.40
codegen_flags: <defaults>
</compile_context>

<pallas_src>
import functools

import jax
import jax.numpy as jnp
from jax.experimental import pallas as pl
from jax.experimental.pallas import tpu as pltpu


# ----------------------------------------------------------------------------
# Pallas kernel: one sample per grid step, 8 matmuls total.
# ----------------------------------------------------------------------------
def agcn_kernel(x_ref, aa_ref, wbig_ref, bbig_ref, wtcn_ref, pvec_ref, out_ref,
                *, IC, ICP, CO, T):
    f32 = jnp.float32
    x = x_ref[0].astype(f32)                                   # (C*T, V)

    # All 1x1 convs at once.  Row layout of F:
    #   [fa_0, fb_0, fa_1, fb_1, fa_2, fb_2,  xd_0, xd_1, xd_2,  down, res]
    F = jnp.dot(wbig_ref[...], x, preferred_element_type=f32) + bbig_ref[...]

    ab = ICP * T                 # rows per attention-feature block (8-aligned)
    cb = CO * T                  # rows per out-channel block       (8-aligned)
    off_xd = 6 * ab
    off_down = off_xd + 3 * cb
    off_res = off_down + cb
    inv_scale = 1.0 / float(IC * T)

    y = jnp.zeros((cb, x.shape[1]), f32)
    for i in range(3):                                         # num_subset = 3
        fa = F[2 * i * ab:(2 * i + 1) * ab, :]                 # (ICP*T, V)
        fb = F[(2 * i + 1) * ab:(2 * i + 2) * ab, :]
        # attn[v, w] = sum_{ic,t} fa[ic,t,v] * fb[ic,t,w]  (zero pad rows inert)
        attn = jax.lax.dot_general(
            fa, fb, (((0,), (0,)), ((), ())),
            preferred_element_type=f32) * inv_scale            # (V, V)
        attn = attn - jnp.max(attn, axis=0, keepdims=True)     # softmax dim=-2
        e = jnp.exp(attn)
        a1 = e / jnp.sum(e, axis=0, keepdims=True) + aa_ref[i]
        # graph conv; conv_d (with gcn-BN scale) already applied in xd rows,
        # so (Wd x) @ A1 == Wd (x @ A1); the conv_d bias is added afterwards.
        xd = F[off_xd + i * cb:off_xd + (i + 1) * cb, :]       # (CO*T, V)
        y = y + jnp.dot(xd, a1, preferred_element_type=f32)

    # gcn epilogue: folded conv_d-bias/BN shift (applied once) + down, ReLU
    g = jnp.maximum(y + pvec_ref[0] + F[off_down:off_down + cb, :], 0.0)
    # tcn: BN -> ReLU -> temporal conv (+ BN2 folded); Dropout(0) == identity
    h = jnp.maximum(g * pvec_ref[1] + pvec_ref[2], 0.0)
    o = jnp.dot(wtcn_ref[...], h, preferred_element_type=f32) + pvec_ref[3]
    # block residual branch + final ReLU — single lane-slab store per sample
    out = jnp.maximum(o + F[off_res:off_res + cb, :], 0.0)
    out_ref[0] = out.astype(out_ref.dtype)


# ----------------------------------------------------------------------------
# Host-side parameter folding / packing.
# ----------------------------------------------------------------------------
def _prepare(params, adj, C, CO, T, V, KT):
    """Fold BN affines into conv weights and expand every weight so each op in
    the kernel is a plain 2-D matmul on (channel*T, V) slabs (row = o*T + t)."""
    f32 = jnp.float32
    IC = params['wa'].shape[1]
    ICP = IC
    while (ICP * T) % 8 != 0:      # keep row-block offsets sublane aligned
        ICP += 1

    eyeT = jnp.eye(T, dtype=f32)

    def kron_t(w):                 # (O, Ci) -> (O*T, Ci*T)
        O, Ci = w.shape
        return (w[:, None, :, None] * eyeT[None, :, None, :]).reshape(O * T, Ci * T)

    def rep_t(v):                  # (O,) / (O,1) -> (O*T, 1)
        return jnp.repeat(v.reshape(-1), T).reshape(-1, 1).astype(f32)

    def vec(name):
        return params[name].reshape(-1).astype(f32)

    gbn_s, gbn_b = vec('gbn_s'), vec('gbn_b')
    dbn_s, dbn_b = vec('dbn_s'), vec('dbn_b')
    t1_s, t1_b = vec('t1_s'), vec('t1_b')
    t2_s, t2_b = vec('t2_s'), vec('t2_b')
    rbn_s, rbn_b = vec('rbn_s'), vec('rbn_b')

    def pad_ic(w):                 # zero-pad inter_channels rows up to ICP
        return jnp.pad(w, ((0, ICP - IC), (0, 0)))

    w_rows, b_rows = [], []
    for i in range(3):             # attention features fa_i, fb_i (with biases)
        w_rows += [kron_t(pad_ic(params['wa'][i])), kron_t(pad_ic(params['wb'][i]))]
        b_rows += [rep_t(pad_ic(params['ba'][i])), rep_t(pad_ic(params['bb'][i]))]
    for i in range(3):             # conv_d with gcn-BN scale folded in
        w_rows.append(kron_t(params['wd'][i] * gbn_s[:, None]))
        b_rows.append(jnp.zeros((CO * T, 1), f32))
    # gcn down branch (conv + BN folded)
    w_rows.append(kron_t(params['wdown'] * dbn_s[:, None]))
    b_rows.append(rep_t(dbn_s * vec('bdown') + dbn_b))
    # block residual branch (conv + BN folded)
    w_rows.append(kron_t(params['wres'] * rbn_s[:, None]))
    b_rows.append(rep_t(rbn_s * vec('bres') + rbn_b))

    w_big = jnp.concatenate(w_rows, axis=0).astype(f32)        # (R, C*T)
    b_big = jnp.concatenate(b_rows, axis=0).astype(f32)        # (R, 1)

    # Temporal conv (kt,1) with the second tcn BN folded -> one (CO*T, CO*T).
    pad = (KT - 1) // 2
    idx = jnp.arange(T)
    wt_big = jnp.zeros((CO * T, CO * T), f32)
    for k in range(KT):
        shift = ((idx[:, None] + (k - pad)) == idx[None, :]).astype(f32)   # (T,T)
        wk = params['wt'][k] * t2_s[:, None]                               # (CO,CO)
        wt_big = wt_big + (wk[:, None, :, None] * shift[None, :, None, :]
                           ).reshape(CO * T, CO * T)

    # Per-row vectors packed into a single array:
    #   [0] conv_d bias sum * gbn_s + gbn_b (applied once)
    #   [1] tcn BN1 scale   [2] tcn BN1 shift   [3] tcn conv bias * t2_s + t2_b
    bd_sum = (params['bd'][0].reshape(-1) + params['bd'][1].reshape(-1)
              + params['bd'][2].reshape(-1))
    pvec = jnp.stack([rep_t(gbn_s * bd_sum + gbn_b),
                      rep_t(t1_s), rep_t(t1_b),
                      rep_t(t2_s * vec('bt') + t2_b)], axis=0)  # (4, CO*T, 1)

    aa = (adj + params['pa']).astype(f32)                       # A + PA, (3,V,V)
    return aa, w_big, b_big, wt_big, pvec, IC, ICP


# ----------------------------------------------------------------------------
# Wrapper
# ----------------------------------------------------------------------------
@jax.jit
def agcn_block_forward(x, adj, params):
    N, C, T, V = x.shape
    CO = params['wd'].shape[1]
    KT = params['wt'].shape[0]
    aa, w_big, b_big, wt_big, pvec, IC, ICP = _prepare(params, adj, C, CO, T, V, KT)
    x_ctv = x.reshape(N, C * T, V)          # same HBM bytes as (N, C, T, V)

    kernel = functools.partial(agcn_kernel, IC=IC, ICP=ICP, CO=CO, T=T)

    def const_spec(a):
        return pl.BlockSpec(a.shape, lambda n, _nd=a.ndim: (0,) * _nd)

    out = pl.pallas_call(
        kernel,
        out_shape=jax.ShapeDtypeStruct((N, CO * T, V), x.dtype),
        grid=(N,),
        in_specs=[pl.BlockSpec((1, C * T, V), lambda n: (n, 0, 0)),
                  const_spec(aa), const_spec(w_big), const_spec(b_big),
                  const_spec(wt_big), const_spec(pvec)],
        out_specs=pl.BlockSpec((1, CO * T, V), lambda n: (n, 0, 0)),
        compiler_params=pltpu.CompilerParams(dimension_semantics=("parallel",)),
    )(x_ctv, aa, w_big, b_big, wt_big, pvec)
    # (N, CO*T, V) is row-major identical to (N, CO, T, V) — pure reshape.
    return out.reshape(N, CO, T, V), adj


# ----------------------------------------------------------------------------
# Deterministic parameter construction (shapes follow the PyTorch __init__).
# ----------------------------------------------------------------------------
def init_params(key, C, CO, V, KT):
    IC = CO // 4
    keys = list(jax.random.split(key, 32))
    kit = iter(keys)

    def w(shape, scale=0.1):
        return (scale * jax.random.normal(next(kit), shape)).astype(jnp.float32)

    def bn_fold():
        gamma = 1.0 + 0.1 * jax.random.normal(next(kit), (CO, 1))
        beta = 0.1 * jax.random.normal(next(kit), (CO, 1))
        mean = 0.1 * jax.random.normal(next(kit), (CO, 1))
        var = 1.0 + 0.1 * jax.random.uniform(next(kit), (CO, 1))
        s = gamma * jax.lax.rsqrt(var + 1e-5)
        return s.astype(jnp.float32), (beta - mean * s).astype(jnp.float32)

    p = {
        'pa': jnp.full((3, V, V), 1e-6, jnp.float32),   # PA, init constant 1e-6
        'wa': w((3, IC, C)), 'ba': w((3, IC, 1)),       # conv_a (1x1)
        'wb': w((3, IC, C)), 'bb': w((3, IC, 1)),       # conv_b (1x1)
        'wd': w((3, CO, C)), 'bd': w((3, CO, 1)),       # conv_d (1x1)
        'wdown': w((CO, C)), 'bdown': w((CO, 1)),       # gcn.down conv (1x1)
        'wt': w((KT, CO, CO)), 'bt': w((CO, 1)),        # tcn conv (kt,1)
        'wres': w((CO, C)), 'bres': w((CO, 1)),         # block residual conv (1x1)
    }
    p['gbn_s'], p['gbn_b'] = bn_fold()   # gcn.bn
    p['dbn_s'], p['dbn_b'] = bn_fold()   # gcn.down BN
    p['t1_s'], p['t1_b'] = bn_fold()     # tcn BN #1
    p['t2_s'], p['t2_b'] = bn_fold()     # tcn BN #2
    p['rbn_s'], p['rbn_b'] = bn_fold()   # residual BN
    return p


# ----------------------------------------------------------------------------
# Pure-JAX reference (unfolded params, same math) for verification.
# ----------------------------------------------------------------------------
def reference(x, adj, p):
    N, C, T, V = x.shape
    IC = p['wa'].shape[1]
    A = adj + p['pa']

    def conv1x1(wmat, b, inp):
        return jnp.einsum('oc,nctv->notv', wmat, inp) + b[None, :, :, None]

    def bn(s, b, inp):
        return inp * s[None, :, :, None] + b[None, :, :, None]

    y = 0.0
    for i in range(3):
        fa = conv1x1(p['wa'][i], p['ba'][i], x)
        fb = conv1x1(p['wb'][i], p['bb'][i], x)
        attn = jnp.einsum('nctv,nctw->nvw', fa, fb) / (IC * T)
        attn = jax.nn.softmax(attn, axis=-2)
        A1 = attn + A[i]
        zp = jnp.einsum('nctw,nwv->nctv', x, A1)
        y = y + conv1x1(p['wd'][i], p['bd'][i], zp)
    y = bn(p['gbn_s'], p['gbn_b'], y)
    d = bn(p['dbn_s'], p['dbn_b'], conv1x1(p['wdown'], p['bdown'], x))
    g = jax.nn.relu(y + d)

    h = jax.nn.relu(bn(p['t1_s'], p['t1_b'], g))
    KT = p['wt'].shape[0]
    PAD = (KT - 1) // 2
    hp = jnp.pad(h, ((0, 0), (0, 0), (PAD, PAD), (0, 0)))
    o = sum(jnp.einsum('oc,nctv->notv', p['wt'][k], hp[:, :, k:k + T, :])
            for k in range(KT)) + p['bt'][None, :, :, None]
    o = bn(p['t2_s'], p['t2_b'], o)

    r = bn(p['rbn_s'], p['rbn_b'], conv1x1(p['wres'], p['bres'], x))
    return jax.nn.relu(o + r), adj


# ----------------------------------------------------------------------------
if __name__ == "__main__":
    key = jax.random.PRNGKey(0)
    N, Cin, Cout, T, V, KT = 2, 4, 16, 4, 17, 3   # AGCNBlock(4, 16, (3, 3)), adj_len=17

    kx, kadj, kp = jax.random.split(key, 3)
    x = jax.random.normal(kx, (N, Cin, T, V), jnp.float32)
    adj = jax.random.uniform(kadj, (3, V, V), jnp.float32)
    params = init_params(kp, Cin, Cout, V, KT)

    out, adj_out = agcn_block_forward(x, adj, params)
    out = jax.block_until_ready(out)

    ref, _ = reference(x, adj, params)
    err = float(jnp.max(jnp.abs(out - ref)))
    assert err < 1e-3, f"kernel/reference mismatch: max abs err = {err}"
    print("KERNEL_OK")
</pallas_src>

<mosaic_0001>
module attributes {stable_mosaic.version = 11 : i64} {
  func.func @agcn_kernel(%arg0: i32, %arg1: memref<1x16x17xf32, #tpu.memory_space<vmem>>, %arg2: memref<3x17x17xf32, #tpu.memory_space<vmem>>, %arg3: memref<416x16xf32, #tpu.memory_space<vmem>>, %arg4: memref<416x1xf32, #tpu.memory_space<vmem>>, %arg5: memref<64x64xf32, #tpu.memory_space<vmem>>, %arg6: memref<4x64x1xf32, #tpu.memory_space<vmem>>, %arg7: memref<1x64x17xf32, #tpu.memory_space<vmem>>) attributes {dimension_semantics = [#tpu.dimension_semantics<parallel>], iteration_bounds = array<i64: 2>, scalar_prefetch = 0 : i64, scratch_operands = 0 : i64, tpu.core_type = #tpu.core_type<tc>, window_params = [{transform_indices = @transform_0, window_bounds = array<i64: 1, 16, 17>}, {pipeline_mode = #tpu.pipeline_mode<synchronous>, transform_indices = @transform_1, window_bounds = array<i64: 3, 17, 17>}, {pipeline_mode = #tpu.pipeline_mode<synchronous>, transform_indices = @transform_2, window_bounds = array<i64: 416, 16>}, {pipeline_mode = #tpu.pipeline_mode<synchronous>, transform_indices = @transform_3, window_bounds = array<i64: 416, 1>}, {pipeline_mode = #tpu.pipeline_mode<synchronous>, transform_indices = @transform_4, window_bounds = array<i64: 64, 64>}, {pipeline_mode = #tpu.pipeline_mode<synchronous>, transform_indices = @transform_5, window_bounds = array<i64: 4, 64, 1>}, {transform_indices = @transform_6, window_bounds = array<i64: 1, 64, 17>}]} {
    %c0 = arith.constant 0 : index
    %c0_0 = arith.constant 0 : index
    %c0_1 = arith.constant 0 : index
    %0 = vector.load %arg1[%c0, %c0_0, %c0_1] : memref<1x16x17xf32, #tpu.memory_space<vmem>>, vector<1x16x17xf32>
    %1 = vector.shape_cast %0 : vector<1x16x17xf32> to vector<16x17xf32>
    %c0_2 = arith.constant 0 : index
    %c0_3 = arith.constant 0 : index
    %2 = vector.load %arg3[%c0_2, %c0_3] : memref<416x16xf32, #tpu.memory_space<vmem>>, vector<416x16xf32>
    %cst = arith.constant dense<0.000000e+00> : vector<416x17xf32>
    %3 = tpu.matmul %2, %1, %cst {dimension_numbers = #tpu.dot_dimension_numbers<[1], [0], [0], [1], [0, 0, 1, 1], [], []>} : vector<416x16xf32>, vector<16x17xf32>, vector<416x17xf32> -> vector<416x17xf32>
    %c0_4 = arith.constant 0 : index
    %c0_5 = arith.constant 0 : index
    %4 = vector.load %arg4[%c0_4, %c0_5] : memref<416x1xf32, #tpu.memory_space<vmem>>, vector<416x1xf32>
    %5 = vector.broadcast %4 : vector<416x1xf32> to vector<416x17xf32>
    %6 = arith.addf %3, %5 : vector<416x17xf32>
    %cst_6 = arith.constant 0.000000e+00 : f32
    %7 = vector.broadcast %cst_6 : f32 to vector<64x17xf32>
    %8 = vector.extract_strided_slice %6 {offsets = [0, 0], sizes = [16, 17], strides = [1, 1]} : vector<416x17xf32> to vector<16x17xf32>
    %9 = vector.extract_strided_slice %6 {offsets = [16, 0], sizes = [16, 17], strides = [1, 1]} : vector<416x17xf32> to vector<16x17xf32>
    %cst_7 = arith.constant dense<0.000000e+00> : vector<17x17xf32>
    %10 = tpu.matmul %8, %9, %cst_7 {dimension_numbers = #tpu.dot_dimension_numbers<[0], [0], [1], [1], [0, 1, 1, 1], [], []>} : vector<16x17xf32>, vector<16x17xf32>, vector<17x17xf32> -> vector<17x17xf32>
    %cst_8 = arith.constant 6.250000e-02 : f32
    %11 = vector.broadcast %cst_8 : f32 to vector<17x17xf32>
    %12 = arith.mulf %10, %11 : vector<17x17xf32>
    %cst_9 = arith.constant dense<0xFF800000> : vector<17xf32>
    %13 = vector.multi_reduction <maximumf>, %12, %cst_9 [0] : vector<17x17xf32> to vector<17xf32>
    %14 = vector.shape_cast %13 : vector<17xf32> to vector<1x17xf32>
    %15 = vector.broadcast %14 : vector<1x17xf32> to vector<17x17xf32>
    %16 = arith.subf %12, %15 : vector<17x17xf32>
    %17 = math.exp %16 : vector<17x17xf32>
    %cst_10 = arith.constant dense<0.000000e+00> : vector<17xf32>
    %18 = vector.multi_reduction <add>, %17, %cst_10 [0] : vector<17x17xf32> to vector<17xf32>
    %19 = vector.shape_cast %18 : vector<17xf32> to vector<1x17xf32>
    %20 = vector.broadcast %19 : vector<1x17xf32> to vector<17x17xf32>
    %21 = arith.divf %17, %20 : vector<17x17xf32>
    %c0_11 = arith.constant 0 : index
    %c0_12 = arith.constant 0 : index
    %c0_13 = arith.constant 0 : index
    %22 = vector.load %arg2[%c0_11, %c0_12, %c0_13] : memref<3x17x17xf32, #tpu.memory_space<vmem>>, vector<1x17x17xf32>
    %23 = vector.shape_cast %22 : vector<1x17x17xf32> to vector<17x17xf32>
    %24 = arith.addf %21, %23 : vector<17x17xf32>
    %25 = vector.extract_strided_slice %6 {offsets = [96, 0], sizes = [64, 17], strides = [1, 1]} : vector<416x17xf32> to vector<64x17xf32>
    %cst_14 = arith.constant dense<0.000000e+00> : vector<64x17xf32>
    %26 = tpu.matmul %25, %24, %cst_14 {dimension_numbers = #tpu.dot_dimension_numbers<[1], [0], [0], [1], [0, 0, 1, 1], [], []>} : vector<64x17xf32>, vector<17x17xf32>, vector<64x17xf32> -> vector<64x17xf32>
    %27 = arith.addf %7, %26 : vector<64x17xf32>
    %28 = vector.extract_strided_slice %6 {offsets = [32, 0], sizes = [16, 17], strides = [1, 1]} : vector<416x17xf32> to vector<16x17xf32>
    %29 = vector.extract_strided_slice %6 {offsets = [48, 0], sizes = [16, 17], strides = [1, 1]} : vector<416x17xf32> to vector<16x17xf32>
    %cst_15 = arith.constant dense<0.000000e+00> : vector<17x17xf32>
    %30 = tpu.matmul %28, %29, %cst_15 {dimension_numbers = #tpu.dot_dimension_numbers<[0], [0], [1], [1], [0, 1, 1, 1], [], []>} : vector<16x17xf32>, vector<16x17xf32>, vector<17x17xf32> -> vector<17x17xf32>
    %cst_16 = arith.constant 6.250000e-02 : f32
    %31 = vector.broadcast %cst_16 : f32 to vector<17x17xf32>
    %32 = arith.mulf %30, %31 : vector<17x17xf32>
    %cst_17 = arith.constant dense<0xFF800000> : vector<17xf32>
    %33 = vector.multi_reduction <maximumf>, %32, %cst_17 [0] : vector<17x17xf32> to vector<17xf32>
    %34 = vector.shape_cast %33 : vector<17xf32> to vector<1x17xf32>
    %35 = vector.broadcast %34 : vector<1x17xf32> to vector<17x17xf32>
    %36 = arith.subf %32, %35 : vector<17x17xf32>
    %37 = math.exp %36 : vector<17x17xf32>
    %cst_18 = arith.constant dense<0.000000e+00> : vector<17xf32>
    %38 = vector.multi_reduction <add>, %37, %cst_18 [0] : vector<17x17xf32> to vector<17xf32>
    %39 = vector.shape_cast %38 : vector<17xf32> to vector<1x17xf32>
    %40 = vector.broadcast %39 : vector<1x17xf32> to vector<17x17xf32>
    %41 = arith.divf %37, %40 : vector<17x17xf32>
    %c1 = arith.constant 1 : index
    %c0_19 = arith.constant 0 : index
    %c0_20 = arith.constant 0 : index
    %42 = vector.load %arg2[%c1, %c0_19, %c0_20] : memref<3x17x17xf32, #tpu.memory_space<vmem>>, vector<1x17x17xf32>
    %43 = vector.shape_cast %42 : vector<1x17x17xf32> to vector<17x17xf32>
    %44 = arith.addf %41, %43 : vector<17x17xf32>
    %45 = vector.extract_strided_slice %6 {offsets = [160, 0], sizes = [64, 17], strides = [1, 1]} : vector<416x17xf32> to vector<64x17xf32>
    %cst_21 = arith.constant dense<0.000000e+00> : vector<64x17xf32>
    %46 = tpu.matmul %45, %44, %cst_21 {dimension_numbers = #tpu.dot_dimension_numbers<[1], [0], [0], [1], [0, 0, 1, 1], [], []>} : vector<64x17xf32>, vector<17x17xf32>, vector<64x17xf32> -> vector<64x17xf32>
    %47 = arith.addf %27, %46 : vector<64x17xf32>
    %48 = vector.extract_strided_slice %6 {offsets = [64, 0], sizes = [16, 17], strides = [1, 1]} : vector<416x17xf32> to vector<16x17xf32>
    %49 = vector.extract_strided_slice %6 {offsets = [80, 0], sizes = [16, 17], strides = [1, 1]} : vector<416x17xf32> to vector<16x17xf32>
    %cst_22 = arith.constant dense<0.000000e+00> : vector<17x17xf32>
    %50 = tpu.matmul %48, %49, %cst_22 {dimension_numbers = #tpu.dot_dimension_numbers<[0], [0], [1], [1], [0, 1, 1, 1], [], []>} : vector<16x17xf32>, vector<16x17xf32>, vector<17x17xf32> -> vector<17x17xf32>
    %cst_23 = arith.constant 6.250000e-02 : f32
    %51 = vector.broadcast %cst_23 : f32 to vector<17x17xf32>
    %52 = arith.mulf %50, %51 : vector<17x17xf32>
    %cst_24 = arith.constant dense<0xFF800000> : vector<17xf32>
    %53 = vector.multi_reduction <maximumf>, %52, %cst_24 [0] : vector<17x17xf32> to vector<17xf32>
    %54 = vector.shape_cast %53 : vector<17xf32> to vector<1x17xf32>
    %55 = vector.broadcast %54 : vector<1x17xf32> to vector<17x17xf32>
    %56 = arith.subf %52, %55 : vector<17x17xf32>
    %57 = math.exp %56 : vector<17x17xf32>
    %cst_25 = arith.constant dense<0.000000e+00> : vector<17xf32>
    %58 = vector.multi_reduction <add>, %57, %cst_25 [0] : vector<17x17xf32> to vector<17xf32>
    %59 = vector.shape_cast %58 : vector<17xf32> to vector<1x17xf32>
    %60 = vector.broadcast %59 : vector<1x17xf32> to vector<17x17xf32>
    %61 = arith.divf %57, %60 : vector<17x17xf32>
    %c2 = arith.constant 2 : index
    %c0_26 = arith.constant 0 : index
    %c0_27 = arith.constant 0 : index
    %62 = vector.load %arg2[%c2, %c0_26, %c0_27] : memref<3x17x17xf32, #tpu.memory_space<vmem>>, vector<1x17x17xf32>
    %63 = vector.shape_cast %62 : vector<1x17x17xf32> to vector<17x17xf32>
    %64 = arith.addf %61, %63 : vector<17x17xf32>
    %65 = vector.extract_strided_slice %6 {offsets = [224, 0], sizes = [64, 17], strides = [1, 1]} : vector<416x17xf32> to vector<64x17xf32>
    %cst_28 = arith.constant dense<0.000000e+00> : vector<64x17xf32>
    %66 = tpu.matmul %65, %64, %cst_28 {dimension_numbers = #tpu.dot_dimension_numbers<[1], [0], [0], [1], [0, 0, 1, 1], [], []>} : vector<64x17xf32>, vector<17x17xf32>, vector<64x17xf32> -> vector<64x17xf32>
    %67 = arith.addf %47, %66 : vector<64x17xf32>
    %c0_29 = arith.constant 0 : index
    %c0_30 = arith.constant 0 : index
    %c0_31 = arith.constant 0 : index
    %68 = vector.load %arg6[%c0_29, %c0_30, %c0_31] : memref<4x64x1xf32, #tpu.memory_space<vmem>>, vector<1x64x1xf32>
    %69 = vector.shape_cast %68 : vector<1x64x1xf32> to vector<64x1xf32>
    %70 = vector.broadcast %69 : vector<64x1xf32> to vector<64x17xf32>
    %71 = arith.addf %67, %70 : vector<64x17xf32>
    %72 = vector.extract_strided_slice %6 {offsets = [288, 0], sizes = [64, 17], strides = [1, 1]} : vector<416x17xf32> to vector<64x17xf32>
    %73 = arith.addf %71, %72 : vector<64x17xf32>
    %cst_32 = arith.constant 0.000000e+00 : f32
    %74 = vector.broadcast %cst_32 : f32 to vector<64x17xf32>
    %75 = arith.maximumf %73, %74 : vector<64x17xf32>
    %c1_33 = arith.constant 1 : index
    %c0_34 = arith.constant 0 : index
    %c0_35 = arith.constant 0 : index
    %76 = vector.load %arg6[%c1_33, %c0_34, %c0_35] : memref<4x64x1xf32, #tpu.memory_space<vmem>>, vector<1x64x1xf32>
    %77 = vector.shape_cast %76 : vector<1x64x1xf32> to vector<64x1xf32>
    %78 = vector.broadcast %77 : vector<64x1xf32> to vector<64x17xf32>
    %79 = arith.mulf %75, %78 : vector<64x17xf32>
    %c2_36 = arith.constant 2 : index
    %c0_37 = arith.constant 0 : index
    %c0_38 = arith.constant 0 : index
    %80 = vector.load %arg6[%c2_36, %c0_37, %c0_38] : memref<4x64x1xf32, #tpu.memory_space<vmem>>, vector<1x64x1xf32>
    %81 = vector.shape_cast %80 : vector<1x64x1xf32> to vector<64x1xf32>
    %82 = vector.broadcast %81 : vector<64x1xf32> to vector<64x17xf32>
    %83 = arith.addf %79, %82 : vector<64x17xf32>
    %cst_39 = arith.constant 0.000000e+00 : f32
    %84 = vector.broadcast %cst_39 : f32 to vector<64x17xf32>
    %85 = arith.maximumf %83, %84 : vector<64x17xf32>
    %c0_40 = arith.constant 0 : index
    %c0_41 = arith.constant 0 : index
    %86 = vector.load %arg5[%c0_40, %c0_41] : memref<64x64xf32, #tpu.memory_space<vmem>>, vector<64x64xf32>
    %cst_42 = arith.constant dense<0.000000e+00> : vector<64x17xf32>
    %87 = tpu.matmul %86, %85, %cst_42 {dimension_numbers = #tpu.dot_dimension_numbers<[1], [0], [0], [1], [0, 0, 1, 1], [], []>} : vector<64x64xf32>, vector<64x17xf32>, vector<64x17xf32> -> vector<64x17xf32>
    %c3 = arith.constant 3 : index
    %c0_43 = arith.constant 0 : index
    %c0_44 = arith.constant 0 : index
    %88 = vector.load %arg6[%c3, %c0_43, %c0_44] : memref<4x64x1xf32, #tpu.memory_space<vmem>>, vector<1x64x1xf32>
    %89 = vector.shape_cast %88 : vector<1x64x1xf32> to vector<64x1xf32>
    %90 = vector.broadcast %89 : vector<64x1xf32> to vector<64x17xf32>
    %91 = arith.addf %87, %90 : vector<64x17xf32>
    %92 = vector.extract_strided_slice %6 {offsets = [352, 0], sizes = [64, 17], strides = [1, 1]} : vector<416x17xf32> to vector<64x17xf32>
    %93 = arith.addf %91, %92 : vector<64x17xf32>
    %cst_45 = arith.constant 0.000000e+00 : f32
    %94 = vector.broadcast %cst_45 : f32 to vector<64x17xf32>
    %95 = arith.maximumf %93, %94 : vector<64x17xf32>
    %c0_46 = arith.constant 0 : index
    %c0_47 = arith.constant 0 : index
    %c0_48 = arith.constant 0 : index
    %96 = vector.load %arg7[%c0_46, %c0_47, %c0_48] : memref<1x64x17xf32, #tpu.memory_space<vmem>>, vector<1x64x17xf32>
    %97 = vector.shape_cast %96 : vector<1x64x17xf32> to vector<64x17xf32>
    %98 = vector.shape_cast %95 : vector<64x17xf32> to vector<1x64x17xf32>
    tpu.vector_store %arg7[%c0_46, %c0_47, %c0_48], %98 {strides = array<i32>} : memref<1x64x17xf32, #tpu.memory_space<vmem>>, vector<1x64x17xf32>,
    return
  }
  func.func @transform_0(%arg0: i32) -> (i32, i32, i32) {
    %c0_i32 = arith.constant 0 : i32
    %c0_i32_0 = arith.constant 0 : i32
    %c0_i32_1 = arith.constant 0 : i32
    return %arg0, %c0_i32, %c0_i32_0 : i32, i32, i32
  }
  func.func @transform_1(%arg0: i32) -> (i32, i32, i32) {
    %c0_i32 = arith.constant 0 : i32
    %c0_i32_0 = arith.constant 0 : i32
    %c0_i32_1 = arith.constant 0 : i32
    %c0_i32_2 = arith.constant 0 : i32
    return %c0_i32, %c0_i32_0, %c0_i32_1 : i32, i32, i32
  }
  func.func @transform_2(%arg0: i32) -> (i32, i32) {
    %c0_i32 = arith.constant 0 : i32
    %c0_i32_0 = arith.constant 0 : i32
    %c0_i32_1 = arith.constant 0 : i32
    return %c0_i32, %c0_i32_0 : i32, i32
  }
  func.func @transform_3(%arg0: i32) -> (i32, i32) {
    %c0_i32 = arith.constant 0 : i32
    %c0_i32_0 = arith.constant 0 : i32
    %c0_i32_1 = arith.constant 0 : i32
    return %c0_i32, %c0_i32_0 : i32, i32
  }
  func.func @transform_4(%arg0: i32) -> (i32, i32) {
    %c0_i32 = arith.constant 0 : i32
    %c0_i32_0 = arith.constant 0 : i32
    %c0_i32_1 = arith.constant 0 : i32
    return %c0_i32, %c0_i32_0 : i32, i32
  }
  func.func @transform_5(%arg0: i32) -> (i32, i32, i32) {
    %c0_i32 = arith.constant 0 : i32
    %c0_i32_0 = arith.constant 0 : i32
    %c0_i32_1 = arith.constant 0 : i32
    %c0_i32_2 = arith.constant 0 : i32
    return %c0_i32, %c0_i32_0, %c0_i32_1 : i32, i32, i32
  }
  func.func @transform_6(%arg0: i32) -> (i32, i32, i32) {
    %c0_i32 = arith.constant 0 : i32
    %c0_i32_0 = arith.constant 0 : i32
    %c0_i32_1 = arith.constant 0 : i32
    return %arg0, %c0_i32, %c0_i32_0 : i32, i32, i32
  }
}

</mosaic_0001>

<bundles_post_ra>
// kernel: agcn_block_forward.1
= control target key start
LH: loop header
LB: loop body
LE: loop exit
PB: predicated region body
PF: predicated region fallthrough
CT: control target
= control target key end

     0   :  { %11 = vsyncpa [#allocation3], 0  ;;  %s3165_s0 = inlined_call_operand.vmem [shape: f32[2,16,17], index: 0, kind: input, shape index: {}]   ;;  %s3166_s1 = inlined_call_operand.vmem [shape: f32[3,17,17], index: 1, kind: input, shape index: {}]   ;;  %s3167_s2 = inlined_call_operand.vmem [shape: f32[416,16], index: 2, kind: input, shape index: {}]   ;;  %s3168_s3 = inlined_call_operand.vmem [shape: f32[416,1], index: 3, kind: input, shape index: {}]   ;;  %s3169_s4 = inlined_call_operand.vmem [shape: f32[64,64], index: 4, kind: input, shape index: {}]   ;;  %s3170_s5 = inlined_call_operand.vmem [shape: f32[4,64,1], index: 5, kind: input, shape index: {}]   ;;  %s3171_s6 = inlined_call_operand.hbm [shape: f32[2,64,17], index: 6, kind: output, shape index: {}]  }
   0x1   :  { %13 = vsyncpa [#allocation3 + $0x1], 0  ;;  %s2273_s21 = smov 0   ;;  %s2275_s22 = smov 0  }
   0x2   :  { %s2277_s23 = smov 0   ;;  %s2279_s24 = smov 0  }
   0x3 LB: > { %s2294_s25 = sadd.s32 4294967295, %s2233_s24   ;;  %s1954_s26 = sadd.s32 4294967294, %s2233_s24   ;;  %s2233_s24 = sphi %s2279_s24, %s3199_s24   ;;  %s2229_s23 = sphi %s2277_s23, %s3198_s23   ;;  %s2225_s22 = sphi %s2275_s22, %s3197_s22   ;;  %s2221_s21 = sphi %s2273_s21, %s3196_s21  }
   0x4   : > { %s2298_s27 = sadd.s32 1, %s2233_s24   ;;  %s157_s28 = sadd.s32 1, %s2229_s23 }
   0x5   : > { %s154_s29 = ssub.s32 %s2233_s24, %s2298_s27  ;;  %p167_p0 = scmp.ne.s32.totalorder %s2229_s23, %s2225_s22 }
   0x6   : > { %p155_p1 = scmp.eq.s32.totalorder %s154_s29, 0  ;;  %p168_p2 = scmp.eq.s32.totalorder %s2294_s25, 1 }
   0x7   : > { %p173_p3 = scmp.ne.s32.totalorder %s2225_s22, %s2221_s21  ;;  %p174_p4 = scmp.eq.s32.totalorder %s1954_s26, 1 }
   0x8   : > { %s2309_s30 = scalar_select %p155_p1, %s2229_s23, %s157_s28  }
   0x9   : > { %p2311_p5 = por %p168_p2, %p167_p0  ;;  %p2315_p6 = por %p174_p4, %p173_p3 }
   0xa   : > { %p1957_p7 = scmp.ge.s32.totalorder %s2233_s24, 1  ;;  %p215_p8 = scmp.lt.s32.totalorder %s2233_s24, 3 }
   0xc   : > { %p216_p9 = pnand %p1957_p7, %p215_p8 }
   0xe   : > { %219 = sbr.rel (%p216_p9) target bundleno = 1187 (0x4a3), region = 44 }
  0x13   : > { %v308_v0 = vld [vmem:[%s3168_s3 + $0x20] sm:$0xff]  ;;  %v311_v1 = vld [vmem:[%s3168_s3 + $0x38] sm:$0xff]  ;;  %p245_p10 = scmp.lt.s32.totalorder %s2294_s25, 1  ;;  %v2235_v2 = vmov 0   ;;  %v309_v5 = vld [vmem:[%s3168_s3 + $0x28] sm:$0xff]  ;;  %vm616_vm0 = vcmask 130048  }
  0x14   : > { %2144 = vset.pattern.permute.xlu0 %v2235_v2  ;;  %2145 = vset.pattern.permute.xlu1 %v2235_v2  ;;  %v252_v6 = vld [vmem:[%s3167_s2] sm:$0xff]  ;;  %v310_v7 = vld [vmem:[%s3168_s3 + $0x30] sm:$0xff]  ;;  %v253_v9 = vld [vmem:[%s3167_s2 + $0x8] sm:$0xff]  ;;  %vm1016_vm1 = vcmask 138240   ;;  %vm1019_vm2 = vcmask 131072   ;;  %vm1221_vm7 = vcmask 1040384  }
  0x15   : > { %378 = vperm.xlu0 %2144, %v308_v0   ;;  %393 = vperm.xlu1 %2145, %v311_v1   ;;  %s246_s13 = scalar_select %p245_p10, %s2294_s25, 1  ;;  %v312_v8 = vld [vmem:[%s3168_s3 + $0x40] sm:$0xff]  ;;  %v305_v11 = vld [vmem:[%s3168_s3 + $0x8] sm:$0xff]  ;;  %v254_v12 = vld [vmem:[%s3167_s2 + $0x10] sm:$0xff] }
  0x16   : > { %v304_v10 = vld [vmem:[%s3168_s3] sm:$0xff]  ;;  %v307_v13 = vld [vmem:[%s3168_s3 + $0x18] sm:$0xff]  ;;  %v306_v15 = vld [vmem:[%s3168_s3 + $0x10] sm:$0xff]  ;;  %s242_s20 = sand.u32 1, %s2225_s22   ;;  %s2093_s29 = sshll.u32 %s2294_s25, 6 }
  0x17   : > { %s2092_s14 = sshll.u32 %s246_s13, 4  ;;  %v255_v14 = vld [vmem:[%s3167_s2 + $0x18] sm:$0xff]  ;;  %v256_v16 = vld [vmem:[%s3167_s2 + $0x20] sm:$0xff]  ;;  %v257_v17 = vld [vmem:[%s3167_s2 + $0x28] sm:$0xff]  ;;  %s1958_s26 = sshll.u32 %s242_s20, 6 }
  0x18   : > { %s249_s17 = scalar_lea.vmem %s3165_s0, %s2092_s14  ;;  %v258_v18 = vld [vmem:[%s3167_s2 + $0x30] sm:$0xff]  ;;  %v259_v19 = vld [vmem:[%s3167_s2 + $0x38] sm:$0xff]  ;;  %v260_v20 = vld [vmem:[%s3167_s2 + $0x40] sm:$0xff]  ;;  %s3106_s28 = scalar_lea.vmem [#allocation2], %s1958_s26 }
  0x19   : > { %v251_v3 = vld [vmem:[%s249_s17 + $0x8] sm:$0xff]  ;;  %v250_v4 = vld [vmem:[%s249_s17] sm:$0xff]  ;;  %v315_v21 = vld [vmem:[%s3168_s3 + $0x58] sm:$0xff]  ;;  %s1888_s11 = scalar_lea.hbm %s3171_s6, %s2093_s29  ;;  %s1889_s12 = sshll.u32 %s3106_s28, 4  ;;  %s1890_s12 = int_to_ptr.vmem [resolvable:$true] %s1889_s12 }
  0x1a   : > { %787 = vmatpush.msra.mxu0 %v251_v3  ;;  %2094 = vmatpush.msra.mxu1 %v251_v3  ;;  %v314_v24 = vld [vmem:[%s3168_s3 + $0x50] sm:$0xff]  ;;  %v261_v27 = vld [vmem:[%s3167_s2 + $0x48] sm:$0xff]  ;;  %v263_v35 = vld [vmem:[%s3167_s2 + $0x58] sm:$0xff]  ;;  %s1891_s13 = sshll.u32 %s1888_s11, 4  ;;  %s1877_s25 = scalar_lea.sflag [#allocation3], %s242_s20  ;;  %s1892_s13 = int_to_ptr.hbm [resolvable:$true] %s1891_s13 }
  0x1b   : > { %2095 = vmatpush.msra.mxu2 %v251_v3  ;;  %v262_v31 = vld [vmem:[%s3167_s2 + $0x50] sm:$0xff]  ;;  %v264_v39 = vld [vmem:[%s3167_s2 + $0x60] sm:$0xff]  ;;  %v265_v42 = vld [vmem:[%s3167_s2 + $0x68] sm:$0xff]  ;;  %s2185_s14 = sshra.s32 %s1892_s13, 4  ;;  %s2191_s18 = scalar_lea.hbm %s3171_s6, 128  ;;  %s2186_s14 = int_to_ptr.hbm [resolvable:$true] %s2185_s14 }
  0x1c   : > { %788 = vmatpush.msra.mxu0 %v250_v4  ;;  %2096 = vmatpush.msra.mxu1 %v250_v4  ;;  %v276_v44 = vld [vmem:[%s3167_s2 + $0xc0] sm:$0xff]  ;;  %v266_v47 = vld [vmem:[%s3167_s2 + $0x70] sm:$0xff]  ;;  %v289_v49 = vld [vmem:[%s3167_s2 + $0x128] sm:$0xff]  ;;  %s2187_s15 = scalar_lea.hbm %s2186_s14, 64  ;;  %p2192_p0 = scmp.lt.s32.totalorder %s2186_s14, %s3171_s6 }
  0x1d   : > { %383 = vperm.xlu0 %2144, %v309_v5   ;;  %1961 = vmatmul.msk.f32.vlgmr.msra.gmra.mxu0 %vm616_vm0, %v252_v6  ;;  %v277_v50 = vld [vmem:[%s3167_s2 + $0xc8] sm:$0xff]  ;;  %v267_v51 = vld [vmem:[%s3167_s2 + $0x78] sm:$0xff]  ;;  %v290_v54 = vld [vmem:[%s3167_s2 + $0x130] sm:$0xff]  ;;  %p2188_p11 = scmp.ne.s32.totalorder %s2186_s14, %s2187_s15  ;;  %p2193_p1 = scmp.lt.s32.totalorder %s2191_s18, %s2187_s15 }
  0x1e   : > { %388 = vperm.xlu1 %2145, %v310_v7   ;;  %2097 = vmatpush.msra.mxu2 %v250_v4  ;;  %v278_v55 = vld [vmem:[%s3167_s2 + $0xd0] sm:$0xff]  ;;  %v268_v56 = vld [vmem:[%s3167_s2 + $0x80] sm:$0xff]  ;;  %v291_v58 = vld [vmem:[%s3167_s2 + $0x138] sm:$0xff] }
  0x1f   : > { %1985 = vmatmul.msk.f32.vlgmr.msra.gmra.mxu1 %vm616_vm0, %v276_v44  ;;  %1998 = vmatmul.msk.f32.vlgmr.msra.gmra.mxu2 %vm616_vm0, %v289_v49  ;;  %v279_v59 = vld [vmem:[%s3167_s2 + $0xd8] sm:$0xff]  ;;  %v269_v60 = vld [vmem:[%s3167_s2 + $0x88] sm:$0xff]  ;;  %v292_v0 = vld [vmem:[%s3167_s2 + $0x140] sm:$0xff]  ;;  %p2189_p12 = pnand %p2188_p11, %p2311_p5  ;;  %p2194_p2 = por %p2193_p1, %p2192_p0 }
  0x20   : > { %v280_v1 = vld [vmem:[%s3167_s2 + $0xe0] sm:$0xff]  ;;  %v270_v3 = vld [vmem:[%s3167_s2 + $0x90] sm:$0xff]  ;;  %v293_v6 = vld [vmem:[%s3167_s2 + $0x148] sm:$0xff] }
  0x21   : > { %v281_v7 = vld [vmem:[%s3167_s2 + $0xe8] sm:$0xff]  ;;  %p2190_p13 = pneg %p2189_p12 }
  0x23   : > { %p2195_p3 = pnand %p2194_p2, %p2190_p13 }
  0x25   : > { %398 = vperm.xlu0 %2144, %v312_v8   ;;  %1962 = vmatmul.msk.f32.gmra.mxu0 %vm616_vm0, %v253_v9  ;;  %v271_v8 = vld [vmem:[%s3167_s2 + $0x98] sm:$0xff]  ;;  %v294_v9 = vld [vmem:[%s3167_s2 + $0x150] sm:$0xff] }
  0x26   : > { %358 = vperm.xlu1 %2145, %v304_v10   ;;  %v282_v10 = vld [vmem:[%s3167_s2 + $0xf0] sm:$0xff] }
  0x27   : > { %1986 = vmatmul.msk.f32.gmra.mxu1 %vm616_vm0, %v277_v50  ;;  %1999 = vmatmul.msk.f32.gmra.mxu2 %vm616_vm0, %v290_v54 }
  0x2d   : > { %363 = vperm.xlu0 %2144, %v305_v11   ;;  %1963 = vmatmul.msk.f32.gmra.mxu0 %vm616_vm0, %v254_v12  ;;  %v272_v11 = vld [vmem:[%s3167_s2 + $0xa0] sm:$0xff]  ;;  %v295_v12 = vld [vmem:[%s3167_s2 + $0x158] sm:$0xff] }
  0x2e   : > { %413 = vperm.xlu1 %2145, %v315_v21   ;;  %v298_v21 = vld [vmem:[%s3167_s2 + $0x170] sm:$0xff] }
  0x2f   : > { %1987 = vmatmul.msk.f32.gmra.mxu1 %vm616_vm0, %v278_v55  ;;  %2000 = vmatmul.msk.f32.gmra.mxu2 %vm616_vm0, %v291_v58  ;;  %v2061_v55 = vld [vmem:[%s3170_s5 + $0x70] sm:$0xff] }
  0x35   : > { %373 = vperm.xlu0 %2144, %v307_v13   ;;  %1964 = vmatmul.msk.f32.gmra.mxu0 %vm616_vm0, %v255_v14  ;;  %v283_v13 = vld [vmem:[%s3167_s2 + $0xf8] sm:$0xff]  ;;  %v273_v14 = vld [vmem:[%s3167_s2 + $0xa8] sm:$0xff] }
  0x36   : > { %408 = vperm.xlu1 %2145, %v314_v24   ;;  %v287_v24 = vld [vmem:[%s3167_s2 + $0x118] sm:$0xff] }
  0x37   : > { %1988 = vmatmul.msk.f32.gmra.mxu1 %vm616_vm0, %v279_v59  ;;  %2001 = vmatmul.msk.f32.gmra.mxu2 %vm616_vm0, %v292_v0  ;;  %v330_v59 = vld [vmem:[%s3168_s3 + $0xd0] sm:$0xff] }
  0x3d   : > { %368 = vperm.xlu0 %2144, %v306_v15   ;;  %1965 = vmatmul.msk.f32.gmra.mxu0 %vm616_vm0, %v256_v16  ;;  %v296_v15 = vld [vmem:[%s3167_s2 + $0x160] sm:$0xff] }
  0x3e   : > { %v284_v16 = vld [vmem:[%s3167_s2 + $0x100] sm:$0xff] }
  0x3f   : > { %1989 = vmatmul.msk.f32.gmra.mxu1 %vm616_vm0, %v280_v1  ;;  %2002 = vmatmul.msk.f32.gmra.mxu2 %vm616_vm0, %v293_v6  ;;  %v331_v1 = vld [vmem:[%s3168_s3 + $0xd8] sm:$0xff]  ;;  %v316_v6 = vld [vmem:[%s3168_s3 + $0x60] sm:$0xff] }
  0x45   : > { %1966 = vmatmul.msk.f32.gmra.mxu0 %vm616_vm0, %v257_v17  ;;  %v274_v17 = vld [vmem:[%s3167_s2 + $0xb0] sm:$0xff] }
  0x47   : > { %1990 = vmatmul.msk.f32.gmra.mxu1 %vm616_vm0, %v281_v7  ;;  %2003 = vmatmul.msk.f32.gmra.mxu2 %vm616_vm0, %v294_v9 }
  0x4d   : > { %1967 = vmatmul.msk.f32.gmra.mxu0 %vm616_vm0, %v258_v18  ;;  %v297_v18 = vld [vmem:[%s3167_s2 + $0x168] sm:$0xff] }
  0x4f   : > { %1991 = vmatmul.msk.f32.gmra.mxu1 %vm616_vm0, %v282_v10  ;;  %2004 = vmatmul.msk.f32.gmra.mxu2 %vm616_vm0, %v295_v12  ;;  %v333_v10 = vld [vmem:[%s3168_s3 + $0xe8] sm:$0xff]  ;;  %v2058_v12 = vld [vmem:[%s3170_s5 + $0x58] sm:$0xff] }
  0x55   : > { %1968 = vmatmul.msk.f32.gmra.mxu0 %vm616_vm0, %v259_v19  ;;  %v285_v19 = vld [vmem:[%s3167_s2 + $0x108] sm:$0xff] }
  0x57   : > { %1992 = vmatmul.msk.f32.gmra.mxu1 %vm616_vm0, %v283_v13  ;;  %2005 = vmatmul.msk.f32.gmra.mxu2 %vm616_vm0, %v296_v15  ;;  %v317_v13 = vld [vmem:[%s3168_s3 + $0x68] sm:$0xff]  ;;  %v2066_v15 = vld [vmem:[%s3170_s5 + $0x98] sm:$0xff] }
  0x5d   : > { %1969 = vmatmul.msk.f32.gmra.mxu0 %vm616_vm0, %v260_v20  ;;  %v275_v20 = vld [vmem:[%s3167_s2 + $0xb8] sm:$0xff] }
  0x5f   : > { %1993 = vmatmul.msk.f32.gmra.mxu1 %vm616_vm0, %v284_v16  ;;  %2006 = vmatmul.msk.f32.gmra.mxu2 %vm616_vm0, %v297_v18 }
  0x65   : > { %1970 = vmatmul.msk.f32.gmra.mxu0 %vm616_vm0, %v261_v27  ;;  %v324_v27 = vld [vmem:[%s3168_s3 + $0xa0] sm:$0xff] }
  0x67   : > { %1994 = vmatmul.msk.f32.gmra.mxu1 %vm616_vm0, %v285_v19  ;;  %2007 = vmatmul.msk.f32.gmra.mxu2 %vm616_vm0, %v298_v21  ;;  %v2055_v19 = vld [vmem:[%s3170_s5 + $0x40] sm:$0xff] }
  0x68   : > { %v336_v21 = vld [vmem:[%s3168_s3 + $0x100] sm:$0xff] }
  0x6d   : > { %1971 = vmatmul.msk.f32.gmra.mxu0 %vm616_vm0, %v262_v31  ;;  %v337_v31 = vld [vmem:[%s3168_s3 + $0x108] sm:$0xff] }
  0x75   : > { %1972 = vmatmul.msk.f32.gmra.mxu0 %vm616_vm0, %v263_v35  ;;  %v326_v35 = vld [vmem:[%s3168_s3 + $0xb0] sm:$0xff] }
  0x7d   : > { %1973 = vmatmul.msk.f32.gmra.mxu0 %vm616_vm0, %v264_v39  ;;  %v327_v39 = vld [vmem:[%s3168_s3 + $0xb8] sm:$0xff] }
  0x85   : > { %1974 = vmatmul.msk.f32.gmra.mxu0 %vm616_vm0, %v265_v42  ;;  %v1540_v42 = vld [vmem:[%s3170_s5 + $0x28] sm:$0xff] }
  0x87   : > { %v379_v22 = vpop.permute.xlu0 %378  ;;  %v394_v23 = vpop.permute.xlu1 %393 }
  0x8d   : > { %1975 = vmatmul.msk.f32.gmra.mxu0 %vm616_vm0, %v266_v47 }
  0x8f   : > { %v384_v25 = vpop.permute.xlu0 %383 }
  0x90   : > { %v389_v26 = vpop.permute.xlu1 %388 }
  0x95   : > { %1976 = vmatmul.msk.f32.gmra.mxu0 %vm616_vm0, %v267_v51  ;;  %v329_v51 = vld [vmem:[%s3168_s3 + $0xc8] sm:$0xff] }
  0x97   : > { %v2401_v28 = vpop.permute.xlu0 %398 }
  0x98   : > { %v359_v29 = vpop.permute.xlu1 %358 }
  0x9a   : > { %v790_v30 = vpop.f32.mrf.mxu0 }
  0x9b   : > { %v791_v32 = vadd.f32 %v790_v30, %v359_v29  ;;  %v319_v29 = vld [vmem:[%s3168_s3 + $0x78] sm:$0xff]  ;;  %v302_v30 = vld [vmem:[%s3167_s2 + $0x190] sm:$0xff] }
  0x9d   : > { %946 = vxpose.xlu0.b32.start [1/2] (short) (narrow) %v791_v32, 24  ;;  %1977 = vmatmul.msk.f32.gmra.mxu0 %vm616_vm0, %v268_v56  ;;  %v303_v32 = vld [vmem:[%s3167_s2 + $0x198] sm:$0xff] }
  0x9f   : > { %v364_v33 = vpop.permute.xlu0 %363 }
  0xa0   : > { %v414_v50 = vpop.permute.xlu1 %413 }
  0xa2   : > { %v793_v34 = vpop.f32.mrf.mxu0 }
  0xa3   : > { %v794_v36 = vadd.f32 %v793_v34, %v364_v33  ;;  %v322_v33 = vld [vmem:[%s3168_s3 + $0x90] sm:$0xff]  ;;  %v332_v34 = vld [vmem:[%s3168_s3 + $0xe0] sm:$0xff] }
  0xa5   : > { %947 = vxpose.xlu0.b32.end [2/2] (short) (narrow) %v794_v36, 24  ;;  %1978 = vmatmul.msk.f32.gmra.mxu0 %vm616_vm0, %v269_v60  ;;  %v2594_v36 = vpop.f32.mrf.mxu1 }
  0xa7   : > { %v374_v37 = vpop.permute.xlu0 %373 }
  0xa8   : > { %v409_v58 = vpop.permute.xlu1 %408 }
  0xaa   : > { %v796_v38 = vpop.f32.mrf.mxu0 }
  0xad   : > { %1979 = vmatmul.msk.f32.gmra.mxu0 %vm616_vm0, %v270_v3  ;;  %v2610_v44 = vpop.f32.mrf.mxu1 }
  0xaf   : > { %v369_v40 = vpop.permute.xlu0 %368 }
  0xb0   : > { %v797_v45 = vadd.f32 %v796_v38, %v369_v40 }
  0xb2   : > { %v799_v41 = vpop.f32.mrf.mxu0 }
  0xb3   : > { %v800_v43 = vadd.f32 %v799_v41, %v374_v37  ;;  %v346_v37 = vld [vmem:[%s3168_s3 + $0x150] sm:$0xff]  ;;  %v2605_v41 = vpop.f32.mrf.mxu2 }
  0xb5   : > { %1001 = vmatpush.msrb.mxu1 %v800_v43  ;;  %1980 = vmatmul.msk.f32.gmra.mxu0 %vm616_vm0, %v271_v8  ;;  %v2068_v8 = vld [vmem:[%s3170_s5 + $0xa8] sm:$0xff] }
  0xb7   : > { %1002 = vmatpush.msrb.mxu1 %v797_v45  ;;  %v328_v45 = vld [vmem:[%s3168_s3 + $0xc0] sm:$0xff] }
  0xba   : > { %v802_v46 = vpop.f32.mrf.mxu0 }
  0xbb   : > { %v803_v48 = vadd.f32 %v802_v46, %v379_v22  ;;  %v286_v22 = vld [vmem:[%s3167_s2 + $0x110] sm:$0xff]  ;;  %v2616_v47 = vpop.f32.mrf.mxu2 }
  0xbc   : > { %1995 = vmatmul.msk.f32.gmra.mxu1 %vm616_vm0, %v286_v22 }
  0xbd   : > { %1072 = vxpose.xlu2.b32.start [1/2] (short) (narrow) %v803_v48, 24  ;;  %1981 = vmatmul.msk.f32.gmra.mxu0 %vm616_vm0, %v272_v11  ;;  %v2062_v48 = vld [vmem:[%s3170_s5 + $0x78] sm:$0xff] }
  0xc2   : > { %v805_v52 = vpop.f32.mrf.mxu0 }
  0xc3   : > { %v806_v53 = vadd.f32 %v805_v52, %v384_v25  ;;  %v300_v25 = vld [vmem:[%s3167_s2 + $0x180] sm:$0xff]  ;;  %v2625_v52 = vpop.f32.mrf.mxu1  ;;  %v2631_v56 = vpop.f32.mrf.mxu2 }
  0xc4   : > { %1996 = vmatmul.msk.f32.gmra.mxu1 %vm616_vm0, %v287_v24 }
  0xc5   : > { %1073 = vxpose.xlu2.b32.end [2/2] (short) (narrow) %v806_v53, 24  ;;  %1982 = vmatmul.msk.f32.gmra.mxu0 %vm616_vm0, %v273_v14 }
  0xca   : > { %v808_v57 = vpop.f32.mrf.mxu0 }
  0xcb   : > { %v809_v62 = vadd.f32 %v808_v57, %v389_v26  ;;  %v288_v26 = vld [vmem:[%s3167_s2 + $0x120] sm:$0xff]  ;;  %v2642_v0 = vpop.f32.mrf.mxu2 }
  0xcc   : > { %1997 = vmatmul.msk.f32.gmra.mxu1 %vm616_vm0, %v288_v26 }
  0xcd   : > { %1983 = vmatmul.msk.f32.gmra.mxu0 %vm616_vm0, %v274_v17  ;;  %v318_v17 = vld [vmem:[%s3168_s3 + $0x70] sm:$0xff] }
  0xd2   : > { %v811_v61 = vpop.f32.mrf.mxu0 }
  0xd3   : > { %v812_v63 = vadd.f32 %v811_v61, %v394_v23  ;;  %v299_v23 = vld [vmem:[%s3167_s2 + $0x178] sm:$0xff]  ;;  %v2636_v61 = vpop.f32.mrf.mxu1  ;;  %v2656_v7 = vpop.f32.mrf.mxu2 }
  0xd4   : > { %2008 = vmatmul.msk.f32.gmra.mxu2 %vm616_vm0, %v299_v23 }
  0xd5   : > { %1127 = vmatpush.msrb.mxu2 %v812_v63  ;;  %1984 = vmatmul.msk.f32.gmra.mxu0 %vm616_vm0, %v275_v20  ;;  %v1537_v63 = vld [vmem:[%s3170_s5 + $0x10] sm:$0xff] }
  0xd7   : > { %1128 = vmatpush.msrb.mxu2 %v809_v62 }
  0xda   : > { %v814_v4 = vpop.f32.mrf.mxu0 }
  0xdb   : > { %v815_v5 = vadd.f32 %v814_v4, %v2401_v28  ;;  %v301_v28 = vld [vmem:[%s3167_s2 + $0x188] sm:$0xff]  ;;  %v2648_v4 = vpop.f32.mrf.mxu1  ;;  %v2666_v11 = vpop.f32.mrf.mxu2 }
  0xdc   : > { %2009 = vmatmul.msk.f32.gmra.mxu2 %vm616_vm0, %v300_v25  ;;  %v348_v25 = vld [vmem:[%s3168_s3 + $0x160] sm:$0xff] }
  0xdd   : > { %1334 = vxpose.xlu1.b32.start [1/2] (short) (narrow) %v815_v5, 24  ;;  %v341_v5 = vld [vmem:[%s3168_s3 + $0x128] sm:$0xff] }
  0xe2   : > { %v2603_v40 = vpop.f32.mrf.mxu0 }
  0xe3   : > { %v2661_v9 = vpop.f32.mrf.mxu1  ;;  %v2679_v16 = vpop.f32.mrf.mxu2 }
  0xe4   : > { %2010 = vmatmul.msk.f32.gmra.mxu2 %vm616_vm0, %v301_v28 }
  0xea   : > { %v820_v46 = vpop.f32.mrf.mxu0 }
  0xeb   : > { %v821_v60 = vadd.f32 %v820_v46, %v409_v58  ;;  %v2674_v14 = vpop.f32.mrf.mxu1  ;;  %v2689_v20 = vpop.f32.mrf.mxu2 }
  0xec   : > { %2011 = vmatmul.msk.f32.gmra.mxu2 %vm616_vm0, %v302_v30  ;;  %3174 = vst [vmem:[#allocation5_spill] sm:$0xff] %v2689_v20  ;;  %v351_v30 = vld [vmem:[%s3168_s3 + $0x178] sm:$0xff] }
  0xf2   : > { %v823_v54 = vpop.f32.mrf.mxu0 }
  0xf3   : > { %v824_v57 = vadd.f32 %v823_v54, %v414_v50  ;;  %v2684_v18 = vpop.f32.mrf.mxu1  ;;  %v2705_v28 = vpop.f32.mrf.mxu2  ;;  %v2078_v50 = vld [vmem:[%s3170_s5 + $0xf8] sm:$0xff] }
  0xf4   : > { %2012 = vmatmul.msk.f32.gmra.mxu2 %vm616_vm0, %v303_v32  ;;  %3175 = vst [vmem:[#allocation6_spill] sm:$0xff] %v2705_v28  ;;  %v339_v32 = vld [vmem:[%s3168_s3 + $0x118] sm:$0xff] }
  0xf5   : > { %1389 = vmatpush.msra.mxu2 %v824_v57 }
  0xf7   : > { %1390 = vmatpush.msra.mxu2 %v821_v60 }
  0xfb   : > { %v2696_v23 = vpop.f32.mrf.mxu1 }
 0x11b   : > { %458 = vperm.xlu0 %2144, %v324_v27   ;;  %v321_v27 = vld [vmem:[%s3168_s3 + $0x88] sm:$0xff] }
 0x123   : > { %433 = vperm.xlu0 %2144, %v319_v29  }
 0x127   : > { %2146 = vset.pattern.permute.xlu2 %v2235_v2  ;;  %v313_v2 = vld [vmem:[%s3168_s3 + $0x48] sm:$0xff] }
 0x12b   : > { %523 = vperm.xlu0 %2144, %v337_v31   ;;  %v889_v31 = vpop.f32.mrf.mxu1 }
 0x133   : > { %448 = vperm.xlu0 %2144, %v322_v33  }
 0x136   : > { %403 = vperm.xlu2 %2146, %v313_v2  }
 0x13b   : > { %498 = vperm.xlu0 %2144, %v332_v34   ;;  %v2717_v34 = vpop.f32.mrf.mxu2 }
 0x13c   : > { %3176 = vst [vmem:[#allocation7_spill] sm:$0xff] %v2717_v34 }
 0x13e   : > { %468 = vperm.xlu2 %2146, %v326_v35   ;;  %v354_v35 = vld [vmem:[%s3168_s3 + $0x190] sm:$0xff] }
 0x141   : > { %v962_v38 = vpop.trf.xlu0 }
 0x142   : > { %2013 = vmatmul.msk.f32.vlgmr.msrb.gmra.mxu1 %vm616_vm0, %v962_v38  ;;  %v347_v38 = vld [vmem:[%s3168_s3 + $0x158] sm:$0xff] }
 0x143   : > { %568 = vperm.xlu0 %2144, %v346_v37   ;;  %v2722_v37 = vpop.f32.mrf.mxu1 }
 0x146   : > { %473 = vperm.xlu2 %2146, %v327_v39   ;;  %v2072_v39 = vld [vmem:[%s3170_s5 + $0xc8] sm:$0xff] }
 0x149   : > { %v963_v43 = vpop.trf.xlu0 }
 0x14a   : > { %2014 = vmatmul.msk.f32.gmra.mxu1 %vm616_vm0, %v963_v43 }
 0x14b   : > { %1570 = vperm.xlu0 %2144, %v1540_v42   ;;  %v1541_v42 = vld [vmem:[%s3170_s5 + $0x30] sm:$0xff]  ;;  %v2735_v43 = vpop.f32.mrf.mxu1 }
 0x14e   : > { %478 = vperm.xlu2 %2146, %v328_v45   ;;  %v2075_v45 = vld [vmem:[%s3170_s5 + $0xe0] sm:$0xff] }
 0x151   : > { %v964_v49 = vpop.trf.xlu0 }
 0x152   : > { %2015 = vmatmul.msk.f32.gmra.mxu1 %vm616_vm0, %v964_v49 }
 0x153   : > { %1653 = vperm.xlu0 %2144, %v2062_v48   ;;  %v344_v48 = vld [vmem:[%s3168_s3 + $0x140] sm:$0xff]  ;;  %v2745_v49 = vpop.f32.mrf.mxu1 }
 0x156   : > { %483 = vperm.xlu2 %2146, %v329_v51   ;;  %v1088_v53 = vpop.trf.xlu2  ;;  %v343_v51 = vld [vmem:[%s3168_s3 + $0x138] sm:$0xff] }
 0x157   : > { %2016 = vmatmul.msk.f32.vlgmr.msrb.gmra.mxu2 %vm616_vm0, %v1088_v53 }
 0x15b   : > { %1648 = vperm.xlu0 %2144, %v2061_v55   ;;  %v2070_v55 = vld [vmem:[%s3170_s5 + $0xb8] sm:$0xff] }
 0x15e   : > { %488 = vperm.xlu2 %2146, %v330_v59   ;;  %v1089_v62 = vpop.trf.xlu2 }
 0x15f   : > { %2017 = vmatmul.msk.f32.gmra.mxu2 %vm616_vm0, %v1089_v62 }
 0x163   : > { %1555 = vperm.xlu0 %2144, %v1537_v63   ;;  %v2060_v63 = vld [vmem:[%s3170_s5 + $0x68] sm:$0xff] }
 0x166   : > { %493 = vperm.xlu2 %2146, %v331_v1   ;;  %v1090_v3 = vpop.trf.xlu2 }
 0x167   : > { %2018 = vmatmul.msk.f32.gmra.mxu2 %vm616_vm0, %v1090_v3 }
 0x16b   : > { %543 = vperm.xlu0 %2144, %v341_v5  }
 0x16e   : > { %418 = vperm.xlu2 %2146, %v316_v6  }
 0x173   : > { %1700 = vperm.xlu0 %2144, %v2068_v8  }
 0x176   : > { %503 = vperm.xlu2 %2146, %v333_v10  }
 0x17b   : > { %1633 = vperm.xlu0 %2144, %v2058_v12  }
 0x17e   : > { %423 = vperm.xlu2 %2146, %v317_v13  }
 0x183   : > { %1690 = vperm.xlu0 %2144, %v2066_v15  }
 0x186   : > { %428 = vperm.xlu2 %2146, %v318_v17   ;;  %v1536_v17 = vld [vmem:[%s3170_s5 + $0x8] sm:$0xff] }
 0x18b   : > { %1618 = vperm.xlu0 %2144, %v2055_v19  }
 0x18d   : > { %v2694_v22 = vpop.permute.xlu0 %458 }
 0x18e   : > { %518 = vperm.xlu2 %2146, %v336_v21  }
 0x190   : > { %v404_v24 = vpop.permute.xlu2 %403 }
 0x191   : > { %v818_v26 = vadd.f32 %v2603_v40, %v404_v24  ;;  %v2730_v40 = vpop.f32.mrf.mxu2 }
 0x192   : > { %3177 = vst [vmem:[#allocation8_spill] sm:$0xff] %v2730_v40 }
 0x193   : > { %1335 = vxpose.xlu1.b32.end [2/2] (short) (narrow) %v818_v26, 24  ;;  %578 = vperm.xlu0 %2144, %v348_v25  }
 0x195   : > { %v2707_v29 = vpop.permute.xlu0 %433 }
 0x196   : > { %443 = vperm.xlu2 %2146, %v321_v27   ;;  %v340_v27 = vld [vmem:[%s3168_s3 + $0x120] sm:$0xff] }
 0x198   : > { %v2760_v62 = vpop.permute.xlu2 %468 }
 0x199   : > { %v2740_v46 = vpop.f32.mrf.mxu2 }
 0x19a   : > { %3178 = vst [vmem:[#allocation9_spill] sm:$0xff] %v2740_v46 }
 0x19b   : > { %593 = vperm.xlu0 %2144, %v351_v30  }
 0x19d   : > { %v524_v33 = vpop.permute.xlu0 %523 }
 0x19e   : > { %v2715_v2 = vadd.f32 %v889_v31, %v524_v33  ;;  %533 = vperm.xlu2 %2146, %v339_v32   ;;  %v2780_v33 = vpop.f32.mrf.mxu0 }
 0x1a0   : > { %v2770_v13 = vpop.permute.xlu2 %473 }
 0x1a1   : > { %v2753_v53 = vpop.f32.mrf.mxu2 }
 0x1a2   : > { %3179 = vst [vmem:[#allocation10_spill] sm:$0xff] %v2753_v53 }
 0x1a3   : > { %608 = vperm.xlu0 %2144, %v354_v35  }
 0x1a6   : > { %573 = vperm.xlu2 %2146, %v347_v38  }
 0x1a8   : > { %v2778_v30 = vpop.permute.xlu2 %478 }
 0x1a9   : > { %v2758_v57 = vpop.f32.mrf.mxu2 }
 0x1aa   : > { %3180 = vst [vmem:[#allocation11_spill] sm:$0xff] %v2758_v57 }
 0x1ab   : > { %1753 = vperm.xlu0 %2144, %v2072_v39  }
 0x1ae   : > { %1575 = vperm.xlu2 %2146, %v1541_v42  }
 0x1b1   : > { %v2767_v10 = vpop.f32.mrf.mxu2 }
 0x1b2   : > { %3181 = vst [vmem:[#allocation12_spill] sm:$0xff] %v2767_v10 }
 0x1b3   : > { %1768 = vperm.xlu0 %2144, %v2075_v45  }
 0x1b6   : > { %558 = vperm.xlu2 %2146, %v344_v48   ;;  %v2067_v48 = vld [vmem:[%s3170_s5 + $0xa0] sm:$0xff] }
 0x1bb   : > { %1783 = vperm.xlu0 %2144, %v2078_v50  }
 0x1be   : > { %553 = vperm.xlu2 %2146, %v343_v51  }
 0x1bf   : > { %v1004_v54 = vpop.f32.mrf.mxu1 }
 0x1c0   : > { %v1013_v59 = vmul.f32 0.0625, %v1004_v54 }
 0x1c2   : > { %v1017_v1 = vsel %vm1016_vm1, %v1013_v59, -inf }
 0x1c6   : > { %1710 = vperm.xlu2 %2146, %v2070_v55  }
 0x1c7   : > { %v1007_v58 = vpop.f32.mrf.mxu1 }
 0x1c8   : > { %v1014_v60 = vmul.f32 0.0625, %v1007_v58  ;;  %v2785_v58 = vpop.permute.xlu2 %483 }
 0x1ca   : > { %v1018_v3 = vsel %vm1016_vm1, %v1014_v60, -inf }
 0x1cb   : > { %v1021_v5 = vmax.f32 %v1017_v1, %v1018_v3 }
 0x1ce   : > { %1643 = vperm.xlu2 %2146, %v2060_v63  }
 0x1cf   : > { %v1010_v6 = vpop.f32.mrf.mxu1 }
 0x1d0   : > { %v1015_v8 = vmul.f32 0.0625, %v1010_v6 }
 0x1d2   : > { %v1020_v12 = vsel %vm1019_vm2, %v1015_v8, -inf }
 0x1d3   : > { %v1022_v15 = vmax.f32 %v1021_v5, %v1020_v12  ;;  %v2791_v5 = vpop.f32.mrf.mxu0 }
 0x1d5   : > { %v1023_v19 = vrot.slane %v1022_v15, 4 }
 0x1d6   : > { %1550 = vperm.xlu2 %2146, %v1536_v17  }
 0x1d7   : > { %v1024_v21 = vmax.f32 %v1022_v15, %v1023_v19 }
 0x1d9   : > { %v1025_v24 = vrot.slane %v1024_v21, 2 }
 0x1da   : > { %v1130_v25 = vpop.f32.mrf.mxu2 }
 0x1db   : > { %v1026_v26 = vmax.f32 %v1024_v21, %v1025_v24  ;;  %v1139_v42 = vmul.f32 0.0625, %v1130_v25 }
 0x1dd   : > { %v1027_v31 = vrot.slane %v1026_v26, 1 }
 0x1de   : > { %538 = vperm.xlu2 %2146, %v340_v27  }
 0x1df   : > { %v1028_v32 = vmax.f32 %v1026_v26, %v1027_v31 }
 0x1e1   : > { %v1029_v35 = vsub.f32 %v1013_v59, %v1028_v32  ;;  %v1030_v38 = vsub.f32 %v1014_v60, %v1028_v32  ;;  %v1031_v39 = vsub.f32 %v1015_v8, %v1028_v32  ;;  %v1142_v59 = vsel %vm1016_vm1, %v1139_v42, -inf  ;;  %v2056_v8 = vld [vmem:[%s3170_s5 + $0x48] sm:$0xff]  ;;  %v2807_v32 = vpop.permute.xlu2 %488 }
 0x1e2   : > { %v1133_v45 = vpop.f32.mrf.mxu2 }
 0x1e3   : > { %v1032_v50 = vmul.f32 1.442695, %v1029_v35  ;;  %v1034_v51 = vmul.f32 1.442695, %v1030_v38  ;;  %v1036_v54 = vmul.f32 1.442695, %v1031_v39 }
 0x1e4   : > { %v1140_v55 = vmul.f32 0.0625, %v1133_v45  ;;  %v325_v39 = vld [vmem:[%s3168_s3 + $0xa8] sm:$0xff] }
 0x1e5   : > { %2147 = vpow2.f32 %v1032_v50  ;;  %v2064_v45 = vld [vmem:[%s3170_s5 + $0x88] sm:$0xff] }
 0x1e6   : > { %2149 = vpow2.f32 %v1034_v51  ;;  %1695 = vperm.xlu2 %2146, %v2067_v48   ;;  %v1143_v60 = vsel %vm1016_vm1, %v1140_v55, -inf  ;;  %v2815_v51 = vpop.f32.mrf.mxu0 }
 0x1e7   : > { %2151 = vpow2.f32 %v1036_v54  ;;  %v1145_v63 = vmax.f32 %v1142_v59, %v1143_v60 }
 0x1ea   : > { %v1136_v1 = vpop.f32.mrf.mxu2 }
 0x1eb   : > { %v2789_v3 = vpop.eup %2147  ;;  %v1141_v6 = vmul.f32 0.0625, %v1136_v1 }
 0x1ec   : > { %v2796_v12 = vpop.eup %2149  ;;  %v1038_v15 = vsel %vm1016_vm1, %v2789_v3, 0.0 }
 0x1ed   : > { %v2800_v17 = vpop.eup %2151  ;;  %v1039_v19 = vsel %vm1016_vm1, %v2796_v12, 0.0  ;;  %v1144_v21 = vsel %vm1019_vm2, %v1141_v6, -inf }
 0x1ee   : > { %v1040_v24 = vadd.f32 %v1039_v19, %v1038_v15  ;;  %v1041_v25 = vsel %vm1019_vm2, %v2800_v17, 0.0  ;;  %v1146_v26 = vmax.f32 %v1145_v63, %v1144_v21  ;;  %1623 = vperm.xlu2 %2146, %v2056_v8   ;;  %v334_v15 = vld [vmem:[%s3168_s3 + $0xf0] sm:$0xff]  ;;  %v2820_v19 = vpop.permute.xlu2 %493  ;;  %v349_v21 = vld [vmem:[%s3168_s3 + $0x168] sm:$0xff] }
 0x1f0   : > { %v1042_v27 = vadd.f32 %v1041_v25, %v1040_v24  ;;  %v1147_v31 = vrot.slane %v1146_v26, 4 }
 0x1f2   : > { %v1043_v35 = vrot.slane %v1042_v27, 4  ;;  %v1148_v38 = vmax.f32 %v1146_v26, %v1147_v31  ;;  %v2825_v31 = vpop.f32.mrf.mxu0 }
 0x1f4   : > { %v1044_v48 = vadd.f32 %v1043_v35, %v1042_v27  ;;  %v1149_v50 = vrot.slane %v1148_v38, 2 }
 0x1f5   : > { %463 = vperm.xlu1 %2145, %v325_v39  }
 0x1f6   : > { %v1045_v54 = vrot.slane %v1044_v48, 2  ;;  %v1150_v59 = vmax.f32 %v1148_v38, %v1149_v50  ;;  %1680 = vperm.xlu2 %2146, %v2064_v45   ;;  %v335_v45 = vld [vmem:[%s3168_s3 + $0xf8] sm:$0xff] }
 0x1f8   : > { %v1046_v60 = vadd.f32 %v1045_v54, %v1044_v48  ;;  %v1151_v63 = vrot.slane %v1150_v59, 1 }
 0x1fa   : > { %v1047_v1 = vrot.slane %v1046_v60, 1  ;;  %v1152_v8 = vmax.f32 %v1150_v59, %v1151_v63 }
 0x1fc   : > { %v1048_v24 = vadd.f32 %v1047_v1, %v1046_v60  ;;  %v1153_v25 = vsub.f32 %v1139_v42, %v1152_v8  ;;  %v1154_v26 = vsub.f32 %v1140_v55, %v1152_v8  ;;  %v1155_v27 = vsub.f32 %v1141_v6, %v1152_v8  ;;  %v352_v42 = vld [vmem:[%s3168_s3 + $0x180] sm:$0xff]  ;;  %v419_v6 = vpop.permute.xlu2 %418 }
 0x1fd   : > { %508 = vperm.xlu1 %2145, %v334_v15   ;;  %v2841_v15 = vpop.f32.mrf.mxu0 }
 0x1fe   : > { %2153 = vrcp.f32 %v1048_v24  ;;  %583 = vperm.xlu2 %2146, %v349_v21   ;;  %v1156_v35 = vmul.f32 1.442695, %v1153_v25  ;;  %v1158_v38 = vmul.f32 1.442695, %v1154_v26  ;;  %v1160_v39 = vmul.f32 1.442695, %v1155_v27 }
 0x1ff   : > { %v1060_v50 = vand.u32 2147483648, %v1048_v24  ;;  %vm1054_vm3 = vweird.f32 %v1048_v24  ;;  %v1058_v60 = vand.u32 2147483647, %v1048_v24 }
 0x200   : > { %2155 = vpow2.f32 %v1156_v35 }
 0x201   : > { %2157 = vpow2.f32 %v1158_v38  ;;  %v1061_v26 = vor.u32 1.1754944e-38, %v1060_v50  ;;  %vm1059_vm6 = vcmp.eq.f32.partialorder %v1058_v60, 8.507059e+37  ;;  %v1068_v50 = vld [vmem:[%s3166_s1 + $0x10] sm:$0x1] }
 0x202   : > { %2159 = vpow2.f32 %v1160_v39  ;;  %v355_v39 = vld [vmem:[%s3168_s3 + $0x198] sm:$0xff] }
 0x204   : > { %v2154_v55 = vpop.eup %2153 }
 0x205   : > { %v1050_v48 = vmul.f32 %v2154_v55, %v1048_v24  ;;  %513 = vperm.xlu1 %2145, %v335_v45   ;;  %vm1055_vm4 = vweird.f32 %v2154_v55  ;;  %v320_v24 = vld [vmem:[%s3168_s3 + $0x80] sm:$0xff] }
 0x206   : > { %598 = vperm.xlu2 %2146, %v352_v42   ;;  %v2833_v54 = vpop.eup %2155  ;;  %vm1056_vm5 = vmor %vm1054_vm3, %vm1055_vm4 }
 0x207   : > { %v1051_v59 = vsub.f32 1.0, %v1050_v48  ;;  %v2835_v63 = vpop.eup %2157  ;;  %v1162_v1 = vsel %vm1016_vm1, %v2833_v54, 0.0 }
 0x208   : > { %v2839_v8 = vpop.eup %2159  ;;  %v1163_v25 = vsel %vm1016_vm1, %v2835_v63, 0.0 }
 0x209   : > { %v1052_v21 = vmul.f32 %v2154_v55, %v1051_v59  ;;  %v1164_v27 = vadd.f32 %v1163_v25, %v1162_v1  ;;  %v1165_v35 = vsel %vm1019_vm2, %v2839_v8, 0.0  ;;  %v1067_v1 = vld [vmem:[%s3166_s1 + $0x8] sm:$0xff] }
 0x20b   : > { %v1053_v38 = vadd.f32 %v2154_v55, %v1052_v21  ;;  %v1166_v45 = vadd.f32 %v1165_v35, %v1164_v27  ;;  %v2860_v21 = vpop.permute.xlu2 %503 }
 0x20d   : > { %v1057_v42 = vsel %vm1056_vm5, %v2154_v55, %v1053_v38  ;;  %438 = vperm.xlu1 %2145, %v320_v24   ;;  %v1167_v59 = vrot.slane %v1166_v45, 4 }
 0x20e   : > { %v1062_v48 = vsel %vm1059_vm6, %v1061_v26, %v1057_v42  ;;  %613 = vperm.xlu2 %2146, %v355_v39   ;;  %v1066_v26 = vld [vmem:[%s3166_s1] sm:$0xff]  ;;  %v338_v39 = vld [vmem:[%s3168_s3 + $0x110] sm:$0xff]  ;;  %v827_v42 = vadd.f32 %v2780_v33, %v419_v6 }
 0x20f   : > { %v1065_v60 = vmul.f32 %v2800_v17, %v1062_v48  ;;  %v1064_v25 = vmul.f32 %v2796_v12, %v1062_v48  ;;  %v1063_v55 = vmul.f32 %v2789_v3, %v1062_v48  ;;  %v1168_v27 = vadd.f32 %v1167_v59, %v1166_v45  ;;  %v2870_v17 = vpop.f32.mrf.mxu0  ;;  %v2073_v3 = vld [vmem:[%s3170_s5 + $0xd0] sm:$0xff] }
 0x211   : > { %v1071_v35 = vadd.f32 %v1068_v50, %v1065_v60  ;;  %v1070_v24 = vadd.f32 %v1067_v1, %v1064_v25  ;;  %v1169_v38 = vrot.slane %v1168_v27, 2  ;;  %v1069_v12 = vadd.f32 %v1066_v26, %v1063_v55  ;;  %v323_v1 = vld [vmem:[%s3168_s3 + $0x98] sm:$0xff]  ;;  %v2076_v60 = vld [vmem:[%s3170_s5 + $0xe8] sm:$0xff] }
 0x213   : > { %2031 = vmatpush.msk.msra.mxu1 %vm1221_vm7, %v1071_v35  ;;  %v1170_v45 = vadd.f32 %v1169_v38, %v1168_v27  ;;  %v424_v50 = vpop.permute.xlu2 %423  ;;  %v1542_v27 = vld [vmem:[%s3170_s5 + $0x38] sm:$0xff] }
 0x214   : > { %v830_v33 = vadd.f32 %v2791_v5, %v424_v50  ;;  %v2021_v50 = vld [vmem:[%s3166_s1 + $0x28] sm:$0x1] }
 0x215   : > { %1307 = vmatpush.msra.mxu1 %v1070_v24  ;;  %528 = vperm.xlu1 %2145, %v338_v39   ;;  %v1171_v48 = vrot.slane %v1170_v45, 1 }
 0x216   : > { %1758 = vperm.xlu2 %2146, %v2073_v3  }
 0x217   : > { %1308 = vmatpush.msra.mxu1 %v1069_v12  ;;  %v1172_v59 = vadd.f32 %v1171_v48, %v1170_v45  ;;  %v2884_v25 = vpop.f32.mrf.mxu0 }
 0x218   : > { %2032 = vmatmul.msk.f32.vlgmr.msra.gmra.mxu1 %vm1016_vm1, %v827_v42 }
 0x219   : > { %2161 = vrcp.f32 %v1172_v59  ;;  %v1184_v24 = vand.u32 2147483648, %v1172_v59  ;;  %v1182_v39 = vand.u32 2147483647, %v1172_v59  ;;  %vm1178_vm9 = vweird.f32 %v1172_v59 }
 0x21b   : > { %v429_v26 = vpop.permute.xlu2 %428  ;;  %v1185_v45 = vor.u32 1.1754944e-38, %v1184_v24  ;;  %vm1183_vm11 = vcmp.eq.f32.partialorder %v1182_v39, 8.507059e+37  ;;  %v1538_v24 = vld [vmem:[%s3170_s5 + $0x18] sm:$0xff]  ;;  %v2069_v39 = vld [vmem:[%s3170_s5 + $0xb0] sm:$0xff] }
 0x21c   : > { %v833_v3 = vadd.f32 %v2815_v51, %v429_v26 }
 0x21d   : > { %453 = vperm.xlu1 %2145, %v323_v1   ;;  %v345_v1 = vld [vmem:[%s3168_s3 + $0x148] sm:$0xff] }
 0x21e   : > { %1773 = vperm.xlu2 %2146, %v2076_v60  }
 0x21f   : > { %v2162_v6 = vpop.eup %2161  ;;  %v2892_v12 = vpop.f32.mrf.mxu0 }
 0x220   : > { %2033 = vmatmul.msk.f32.gmra.mxu1 %vm1016_vm1, %v830_v33  ;;  %v1174_v55 = vmul.f32 %v2162_v6, %v1172_v59  ;;  %vm1179_vm8 = vweird.f32 %v2162_v6  ;;  %v2020_v59 = vld [vmem:[%s3166_s1 + $0x20] sm:$0xff] }
 0x221   : > { %vm1180_vm10 = vmor %vm1178_vm9, %vm1179_vm8 }
 0x222   : > { %v1175_v35 = vsub.f32 1.0, %v1174_v55  ;;  %v836_v55 = vadd.f32 %v2825_v31, %v2707_v29  ;;  %v1539_v29 = vld [vmem:[%s3170_s5 + $0x20] sm:$0xff] }
 0x224   : > { %v1176_v38 = vmul.f32 %v2162_v6, %v1175_v35 }
 0x225   : > { %1580 = vperm.xlu1 %2145, %v1542_v27   ;;  %v2019_v27 = vld [vmem:[%s3166_s1 + $0x18] sm:$0xff] }
 0x226   : > { %v1177_v5 = vadd.f32 %v2162_v6, %v1176_v38 }
 0x228   : > { %2034 = vmatmul.msk.f32.gmra.mxu1 %vm1016_vm1, %v833_v3  ;;  %v1181_v42 = vsel %vm1180_vm10, %v2162_v6, %v1177_v5  ;;  %v2059_v3 = vld [vmem:[%s3170_s5 + $0x60] sm:$0xff] }
 0x229   : > { %v1186_v48 = vsel %vm1183_vm11, %v1185_v45, %v1181_v42  ;;  %v1535_v5 = vld [vmem:[%s3170_s5] sm:$0xff]  ;;  %v2057_v42 = vld [vmem:[%s3170_s5 + $0x50] sm:$0xff] }
 0x22a   : > { %v1189_v51 = vmul.f32 %v2839_v8, %v1186_v48  ;;  %v1188_v60 = vmul.f32 %v2835_v63, %v1186_v48  ;;  %v1187_v6 = vmul.f32 %v2833_v54, %v1186_v48  ;;  %v850_v63 = vpop.f32.mrf.mxu0 }
 0x22b   : > { %v851_v54 = vadd.f32 %v850_v63, %v2694_v22  ;;  %v342_v22 = vld [vmem:[%s3168_s3 + $0x130] sm:$0xff]  ;;  %v863_v63 = vadd.f32 %v2594_v36, %v2778_v30  ;;  %v2071_v36 = vld [vmem:[%s3170_s5 + $0xc0] sm:$0xff] }
 0x22c   : > { %v1196_v33 = vadd.f32 %v2021_v50, %v1189_v51  ;;  %v1195_v8 = vadd.f32 %v2020_v59, %v1188_v60  ;;  %v1194_v35 = vadd.f32 %v2019_v27, %v1187_v6 }
 0x22d   : > { %563 = vperm.xlu1 %2145, %v345_v1   ;;  %v2065_v1 = vld [vmem:[%s3170_s5 + $0x90] sm:$0xff] }
 0x22e   : > { %2022 = vmatpush.msk.msra.mxu3 %vm1221_vm7, %v1196_v33  ;;  %v2063_v33 = vld [vmem:[%s3170_s5 + $0x80] sm:$0xff] }
 0x22f   : > { %v1350_v26 = vpop.trf.xlu1 }
 0x230   : > { %2035 = vmatmul.msk.f32.gmra.mxu1 %vm1016_vm1, %v836_v55  ;;  %2040 = vmatmul.msk.f32.vlgmr.msra.gmra.mxu2 %vm616_vm0, %v1350_v26  ;;  %v2958_v26 = vpop.permute.xlu2 %518 }
 0x231   : > { %1239 = vmatpush.msra.mxu3 %v1195_v8  ;;  %v350_v8 = vld [vmem:[%s3168_s3 + $0x170] sm:$0xff] }
 0x232   : > { %v853_v45 = vpop.f32.mrf.mxu0 }
 0x233   : > { %1240 = vmatpush.msra.mxu3 %v1194_v35 }
 0x234   : > { %2023 = vmatmul.msk.f32.vlgmr.msra.gmra.mxu3 %vm1016_vm1, %v851_v54 }
 0x235   : > { %1565 = vperm.xlu1 %2145, %v1539_v29   ;;  %v866_v29 = vadd.f32 %v2610_v44, %v2785_v58  ;;  %v2074_v44 = vld [vmem:[%s3170_s5 + $0xd8] sm:$0xff] }
 0x237   : > { %v1351_v31 = vpop.trf.xlu1 }
 0x238   : > { %2041 = vmatmul.msk.f32.gmra.mxu2 %vm616_vm0, %v1351_v31  ;;  %v444_v54 = vpop.permute.xlu2 %443 }
 0x239   : > { %v842_v31 = vadd.f32 %v2870_v17, %v444_v54  ;;  %v872_v17 = vadd.f32 %v2636_v61, %v2820_v19 }
 0x23a   : > { %v856_v51 = vpop.f32.mrf.mxu0 }
 0x23b   : > { %v857_v59 = vadd.f32 %v856_v51, %v2760_v62 }
 0x23d   : > { %1560 = vperm.xlu1 %2145, %v1538_v24  }
 0x23f   : > { %v1352_v38 = vpop.trf.xlu1 }
 0x240   : > { %2042 = vmatmul.msk.f32.gmra.mxu2 %vm616_vm0, %v1352_v38  ;;  %v869_v38 = vadd.f32 %v2625_v52, %v2807_v32  ;;  %v2077_v52 = vld [vmem:[%s3170_s5 + $0xf0] sm:$0xff]  ;;  %vm1786_vm0 = vcmask 523264  }
 0x242   : > { %v859_v6 = vpop.f32.mrf.mxu0 }
 0x243   : > { %v860_v27 = vadd.f32 %v859_v6, %v2770_v13  ;;  %v353_v13 = vld [vmem:[%s3168_s3 + $0x188] sm:$0xff] }
 0x245   : > { %548 = vperm.xlu1 %2145, %v342_v22  }
 0x24d   : > { %1705 = vperm.xlu1 %2145, %v2069_v39  }
 0x255   : > { %1638 = vperm.xlu1 %2145, %v2059_v3  }
 0x25d   : > { %1545 = vperm.xlu1 %2145, %v1535_v5  }
 0x265   : > { %1628 = vperm.xlu1 %2145, %v2057_v42  }
 0x267   : > { %v464_v48 = vpop.permute.xlu1 %463 }
 0x268   : > { %v854_v50 = vadd.f32 %v853_v45, %v464_v48 }
 0x26a   : > { %2024 = vmatmul.msk.f32.gmra.mxu3 %vm1016_vm1, %v854_v50 }
 0x26d   : > { %1685 = vperm.xlu1 %2145, %v2065_v1  }
 0x26f   : > { %v2944_v60 = vpop.permute.xlu1 %508 }
 0x272   : > { %2025 = vmatmul.msk.f32.gmra.mxu3 %vm1016_vm1, %v857_v59 }
 0x275   : > { %1675 = vperm.xlu1 %2145, %v2063_v33  }
 0x277   : > { %v2951_v55 = vpop.permute.xlu1 %513 }
 0x27a   : > { %2026 = vmatmul.msk.f32.gmra.mxu3 %vm1016_vm1, %v860_v27 }
 0x27d   : > { %588 = vperm.xlu1 %2145, %v350_v8  }
 0x27f   : > { %v439_v62 = vpop.permute.xlu1 %438 }
 0x280   : > { %v839_v35 = vadd.f32 %v2841_v15, %v439_v62  ;;  %v449_v15 = vpop.permute.xlu0 %448 }
 0x281   : > { %v845_v24 = vadd.f32 %v2884_v25, %v449_v15 }
 0x282   : > { %2027 = vmatmul.msk.f32.gmra.mxu3 %vm1016_vm1, %v863_v63  ;;  %2036 = vmatmul.msk.f32.gmra.mxu1 %vm1016_vm1, %v839_v35 }
 0x285   : > { %603 = vperm.xlu1 %2145, %v353_v13  }
 0x287   : > { %v2976_v30 = vpop.permute.xlu1 %528 }
 0x28a   : > { %2028 = vmatmul.msk.f32.gmra.mxu3 %vm1016_vm1, %v866_v29  ;;  %2037 = vmatmul.msk.f32.gmra.mxu1 %vm1016_vm1, %v842_v31 }
 0x28d   : > { %1748 = vperm.xlu1 %2145, %v2071_v36  }
 0x28f   : > { %v454_v58 = vpop.permute.xlu1 %453 }
 0x290   : > { %v848_v22 = vadd.f32 %v2892_v12, %v454_v58 }
 0x292   : > { %2029 = vmatmul.msk.f32.gmra.mxu3 %vm1016_vm1, %v869_v38  ;;  %2038 = vmatmul.msk.f32.gmra.mxu1 %vm1016_vm1, %v845_v24 }
 0x295   : > { %1763 = vperm.xlu1 %2145, %v2074_v44   ;;  %v1310_v25 = vpop.f32.mrf.mxu1 }
 0x29a   : > { %2030 = vmatmul.msk.f32.gmra.mxu3 %vm1016_vm1, %v872_v17  ;;  %2039 = vmatmul.msk.f32.gmra.mxu1 %vm1016_vm1, %v848_v22 }
 0x29d   : > { %1778 = vperm.xlu1 %2145, %v2077_v52  }
 0x2b3   : > { %v1392_v32 = vpop.f32.mrf.mxu2 }
 0x2b4   : > { %v1401_v42 = vmul.f32 0.0625, %v1392_v32 }
 0x2b6   : > { %v1404_v12 = vsel %vm1016_vm1, %v1401_v42, -inf }
 0x2b7   : > { %v1242_v39 = vpop.f32.mrf.mxu3 }
 0x2b8   : > { %v2994_v3 = vadd.f32 %v1310_v25, %v1242_v39 }
 0x2bb   : > { %v1395_v5 = vpop.f32.mrf.mxu2 }
 0x2bc   : > { %v1402_v45 = vmul.f32 0.0625, %v1395_v5 }
 0x2be   : > { %v1405_v61 = vsel %vm1016_vm1, %v1402_v45, -inf }
 0x2bf   : > { %v1407_v50 = vmax.f32 %v1404_v12, %v1405_v61 }
 0x2c3   : > { %v1398_v19 = vpop.f32.mrf.mxu2 }
 0x2c4   : > { %v1403_v48 = vmul.f32 0.0625, %v1398_v19 }
 0x2c6   : > { %v1406_v1 = vsel %vm1019_vm2, %v1403_v48, -inf }
 0x2c7   : > { %v1408_v51 = vmax.f32 %v1407_v50, %v1406_v1 }
 0x2c9   : > { %v1409_v59 = vrot.slane %v1408_v51, 4 }
 0x2cb   : > { %v1410_v33 = vmax.f32 %v1408_v51, %v1409_v59 }
 0x2cd   : > { %v1411_v6 = vrot.slane %v1410_v33, 2 }
 0x2cf   : > { %v1412_v27 = vmax.f32 %v1410_v33, %v1411_v6  ;;  %v2045_v6 = vld [vmem:[%s3166_s1 + $0x40] sm:$0x1] }
 0x2d1   : > { %v1413_v8 = vrot.slane %v1412_v27, 1 }
 0x2d3   : > { %v1414_v62 = vmax.f32 %v1412_v27, %v1413_v8 }
 0x2d5   : > { %v1415_v63 = vsub.f32 %v1401_v42, %v1414_v62  ;;  %v1416_v35 = vsub.f32 %v1402_v45, %v1414_v62  ;;  %v1417_v13 = vsub.f32 %v1403_v48, %v1414_v62  ;;  %v2044_v62 = vld [vmem:[%s3166_s1 + $0x38] sm:$0xff] }
 0x2d7   : > { %v1418_v54 = vmul.f32 1.442695, %v1415_v63  ;;  %v1420_v29 = vmul.f32 1.442695, %v1416_v35  ;;  %v1422_v31 = vmul.f32 1.442695, %v1417_v13 }
 0x2d8   : > { %v2043_v13 = vld [vmem:[%s3166_s1 + $0x30] sm:$0xff] }
 0x2d9   : > { %2163 = vpow2.f32 %v1418_v54  ;;  %v499_v54 = vpop.permute.xlu0 %498 }
 0x2da   : > { %2165 = vpow2.f32 %v1420_v29 }
 0x2db   : > { %2167 = vpow2.f32 %v1422_v31 }
 0x2df   : > { %v2164_v36 = vpop.eup %2163 }
 0x2e0   : > { %v2166_v15 = vpop.eup %2165  ;;  %v1424_v24 = vsel %vm1016_vm1, %v2164_v36, 0.0 }
 0x2e1   : > { %v2168_v38 = vpop.eup %2167  ;;  %v1425_v44 = vsel %vm1016_vm1, %v2166_v15, 0.0 }
 0x2e2   : > { %v1426_v58 = vadd.f32 %v1425_v44, %v1424_v24  ;;  %v1427_v17 = vsel %vm1019_vm2, %v2168_v38, 0.0  ;;  %v878_v24 = vadd.f32 %v2661_v9, %v2860_v21  ;;  %v893_v9 = vadd.f32 %v2722_v37, %v2976_v30 }
 0x2e4   : > { %v1428_v22 = vadd.f32 %v1427_v17, %v1426_v58 }
 0x2e6   : > { %v1429_v52 = vrot.slane %v1428_v22, 4 }
 0x2e8   : > { %v1430_v32 = vadd.f32 %v1429_v52, %v1428_v22 }
 0x2ea   : > { %v1431_v25 = vrot.slane %v1430_v32, 2 }
 0x2ec   : > { %v1432_v39 = vadd.f32 %v1431_v25, %v1430_v32  ;;  %v1313_v32 = vpop.f32.mrf.mxu1 }
 0x2ee   : > { %v1433_v5 = vrot.slane %v1432_v39, 1 }
 0x2f0   : > { %v1434_v45 = vadd.f32 %v1433_v5, %v1432_v39 }
 0x2f2   : > { %2169 = vrcp.f32 %v1434_v45  ;;  %v1446_v12 = vand.u32 2147483648, %v1434_v45  ;;  %v1444_v50 = vand.u32 2147483647, %v1434_v45  ;;  %vm1440_vm13 = vweird.f32 %v1434_v45 }
 0x2f4   : > { %v1447_v51 = vor.u32 1.1754944e-38, %v1446_v12  ;;  %vm1445_vm15 = vcmp.eq.f32.partialorder %v1444_v50, 8.507059e+37 }
 0x2f8   : > { %v2170_v42 = vpop.eup %2169 }
 0x2f9   : > { %v1436_v61 = vmul.f32 %v2170_v42, %v1434_v45  ;;  %vm1441_vm12 = vweird.f32 %v2170_v42  ;;  %v1316_v45 = vpop.f32.mrf.mxu1 }
 0x2fa   : > { %vm1442_vm14 = vmor %vm1440_vm13, %vm1441_vm12 }
 0x2fb   : > { %v1437_v19 = vsub.f32 1.0, %v1436_v61 }
 0x2fd   : > { %v1438_v48 = vmul.f32 %v2170_v42, %v1437_v19 }
 0x2ff   : > { %v1439_v1 = vadd.f32 %v2170_v42, %v1438_v48 }
 0x301   : > { %v1443_v59 = vsel %vm1442_vm14, %v2170_v42, %v1439_v1  ;;  %v1319_v48 = vpop.f32.mrf.mxu1 }
 0x302   : > { %v1448_v33 = vsel %vm1445_vm15, %v1447_v51, %v1443_v59 }
 0x303   : > { %v1451_v27 = vmul.f32 %v2168_v38, %v1448_v33  ;;  %v1450_v8 = vmul.f32 %v2166_v15, %v1448_v33  ;;  %v1449_v35 = vmul.f32 %v2164_v36, %v1448_v33  ;;  %v875_v15 = vadd.f32 %v2648_v4, %v499_v54 }
 0x304   : > { %v881_v36 = vadd.f32 %v2674_v14, %v2944_v60  ;;  %v884_v38 = vadd.f32 %v2684_v18, %v2951_v55  ;;  %v887_v4 = vadd.f32 %v2696_v23, %v2958_v26  ;;  %v534_v14 = vpop.permute.xlu2 %533  ;;  %v1245_v18 = vpop.f32.mrf.mxu3 }
 0x305   : > { %v1458_v63 = vadd.f32 %v2045_v6, %v1451_v27  ;;  %v1457_v29 = vadd.f32 %v2044_v62, %v1450_v8  ;;  %v1456_v31 = vadd.f32 %v2043_v13, %v1449_v35  ;;  %v896_v21 = vadd.f32 %v2735_v43, %v534_v14  ;;  %v3036_v26 = vpop.permute.xlu1 %1580 }
 0x307   : > { %2046 = vmatpush.msk.msrb.mxu2 %vm1221_vm7, %v1458_v63  ;;  %2098 = vmatpush.msk.msrb.mxu3 %vm1221_vm7, %v1458_v63 }
 0x309   : > { %1500 = vmatpush.msrb.mxu2 %v1457_v29  ;;  %2099 = vmatpush.msrb.mxu3 %v1457_v29  ;;  %v1322_v59 = vpop.f32.mrf.mxu1 }
 0x30b   : > { %1501 = vmatpush.msrb.mxu2 %v1456_v31  ;;  %2100 = vmatpush.msrb.mxu3 %v1456_v31 }
 0x30c   : > { %2047 = vmatmul.msk.f32.vlgmr.msrb.gmra.mxu2 %vm1016_vm1, %v875_v15  ;;  %2048 = vmatmul.msk.f32.vlgmr.msrb.gmra.mxu3 %vm1016_vm1, %v878_v24  ;;  %v1248_v60 = vpop.f32.mrf.mxu3  ;;  %v3034_v23 = vpop.permute.xlu2 %573 }
 0x30d   : > { %v564_v22 = vpop.permute.xlu1 %563  ;;  %v1317_v40 = vadd.f32 %v1316_v45, %v1248_v60 }
 0x311   : > { %v1325_v63 = vpop.f32.mrf.mxu1 }
 0x314   : > { %2049 = vmatmul.msk.f32.gmra.mxu3 %vm1016_vm1, %v881_v36  ;;  %v1251_v55 = vpop.f32.mrf.mxu3  ;;  %v1576_v17 = vpop.permute.xlu2 %1575 }
 0x315   : > { %v1566_v25 = vpop.permute.xlu1 %1565  ;;  %v1320_v10 = vadd.f32 %v1319_v48, %v1251_v55 }
 0x319   : > { %v1328_v31 = vpop.f32.mrf.mxu1 }
 0x31c   : > { %2050 = vmatmul.msk.f32.gmra.mxu3 %vm1016_vm1, %v884_v38  ;;  %v1254_v44 = vpop.f32.mrf.mxu3  ;;  %v559_v52 = vpop.permute.xlu2 %558 }
 0x31d   : > { %v1561_v42 = vpop.permute.xlu1 %1560 }
 0x324   : > { %2051 = vmatmul.msk.f32.gmra.mxu3 %vm1016_vm1, %v887_v4  ;;  %v1257_v58 = vpop.f32.mrf.mxu3  ;;  %v554_v5 = vpop.permute.xlu2 %553 }
 0x325   : > { %v549_v1 = vpop.permute.xlu1 %548  ;;  %v1326_v24 = vadd.f32 %v1325_v63, %v1257_v58 }
 0x32c   : > { %2052 = vmatmul.msk.f32.gmra.mxu3 %vm1016_vm1, %v2715_v2  ;;  %v569_v2 = vpop.permute.xlu0 %568  ;;  %v1260_v37 = vpop.f32.mrf.mxu3 }
 0x32d   : > { %v3042_v12 = vpop.permute.xlu2 %1710  ;;  %v3046_v27 = vpop.permute.xlu1 %1705  ;;  %v1329_v36 = vadd.f32 %v1328_v31, %v1260_v37  ;;  %v917_v46 = vadd.f32 %v2666_v11, %v569_v2 }
 0x32e   : > { %3182 = vst [vmem:[#allocation13_spill] sm:$0xff] %v3046_v27  ;;  %v1331_v27 = vpop.f32.mrf.mxu1 }
 0x334   : > { %2053 = vmatmul.msk.f32.gmra.mxu3 %vm1016_vm1, %v893_v9  ;;  %v1571_v30 = vpop.permute.xlu0 %1570  ;;  %v1263_v43 = vpop.f32.mrf.mxu3  ;;  %v1323_v9 = vadd.f32 %v1322_v59, %v1254_v44  ;;  %v911_v59 = vadd.f32 %v2642_v0, %v559_v52  ;;  %v905_v0 = vadd.f32 %v2616_v47, %v549_v1 }
 0x335   : > { %v3044_v6 = vpop.permute.xlu2 %1643  ;;  %v3048_v13 = vpop.permute.xlu1 %1638  ;;  %v1332_v58 = vadd.f32 %v1331_v27, %v1263_v43  ;;  %v3185_v1 = vld [vmem:[#allocation13_spill] sm:$0xff] }
 0x336   : > { %3183 = vst [vmem:[#allocation14_spill] sm:$0xff] %v3048_v13  ;;  %v1314_v13 = vadd.f32 %v1313_v32, %v1245_v18 }
 0x33c   : > { %2054 = vmatmul.msk.f32.gmra.mxu3 %vm1016_vm1, %v896_v21  ;;  %v3038_v39 = vpop.permute.xlu0 %1653 }
 0x33d   : > { %v1551_v35 = vpop.permute.xlu2 %1550  ;;  %v1546_v38 = vpop.permute.xlu1 %1545 }
 0x344   : > { %v3040_v19 = vpop.permute.xlu0 %1648 }
 0x345   : > { %v539_v15 = vpop.permute.xlu2 %538  ;;  %v1629_v18 = vpop.permute.xlu1 %1628 }
 0x346   : > { %v899_v43 = vadd.f32 %v2745_v49, %v539_v15 }
 0x34c   : > { %v1556_v51 = vpop.permute.xlu0 %1555 }
 0x34d   : > { %v1696_v55 = vpop.permute.xlu2 %1695 }
 0x354   : > { %v544_v62 = vpop.permute.xlu0 %543 }
 0x355   : > { %v902_v52 = vadd.f32 %v2605_v41, %v544_v62  ;;  %v1686_v62 = vpop.permute.xlu1 %1685 }
 0x35c   : > { %v3050_v29 = vpop.permute.xlu0 %1700 }
 0x35d   : > { %3184 = vst [vmem:[#allocation15_spill] sm:$0xff] %v3050_v29  ;;  %v914_v29 = vadd.f32 %v2656_v7, %v564_v22  ;;  %v908_v7 = vadd.f32 %v2631_v56, %v554_v5 }
 0x364   : > { %v1634_v20 = vpop.permute.xlu0 %1633 }
 0x38f   : > { %v1506_v61 = vpop.f32.mrf.mxu3  ;;  %v1503_v37 = vpop.f32.mrf.mxu2 }
 0x390   : > { %v1527_v2 = vadd.f32 %v1503_v37, %v2994_v3  ;;  %v1691_v3 = vpop.permute.xlu0 %1690 }
 0x392   : > { %v1583_v32 = vadd.f32 %v1546_v38, %v1527_v2 }
 0x397   : > { %v1509_v50 = vpop.f32.mrf.mxu3 }
 0x398   : > { %v1529_v63 = vadd.f32 %v1509_v50, %v1317_v40 }
 0x39a   : > { %v1585_v22 = vadd.f32 %v1556_v51, %v1529_v63  ;;  %v1676_v63 = vpop.permute.xlu1 %1675 }
 0x39f   : > { %v1512_v33 = vpop.f32.mrf.mxu3 }
 0x3a0   : > { %v1530_v34 = vadd.f32 %v1512_v33, %v1320_v10  ;;  %v920_v10 = vadd.f32 %v2679_v16, %v3034_v23  ;;  %v1593_v16 = vadd.f32 %v1585_v22, %v905_v0  ;;  %v3186_v33 = vld [vmem:[#allocation14_spill] sm:$0xff] }
 0x3a2   : > { %v1601_v50 = vmax.f32 %v1593_v16, 0.0  ;;  %v589_v2 = vpop.permute.xlu1 %588 }
 0x3a7   : > { %v1515_v8 = vpop.f32.mrf.mxu3 }
 0x3a8   : > { %v1531_v57 = vadd.f32 %v1515_v8, %v1323_v9  ;;  %v1586_v8 = vadd.f32 %v1561_v42, %v1530_v34  ;;  %v1624_v42 = vpop.permute.xlu2 %1623 }
 0x3aa   : > { %v1587_v31 = vadd.f32 %v1566_v25, %v1531_v57 }
 0x3ac   : > { %v1595_v40 = vadd.f32 %v1587_v31, %v911_v59 }
 0x3ae   : > { %v1603_v23 = vmax.f32 %v1595_v40, 0.0 }
 0x3af   : > { %v1518_v54 = vpop.f32.mrf.mxu3 }
 0x3b0   : > { %v1532_v14 = vadd.f32 %v1518_v54, %v1326_v24  ;;  %v1660_v27 = vmul.f32 %v3186_v33, %v1603_v23 }
 0x3b2   : > { %v1588_v28 = vadd.f32 %v1571_v30, %v1532_v14  ;;  %v1594_v30 = vadd.f32 %v1586_v8, %v908_v7  ;;  %v1717_v15 = vadd.f32 %v1696_v55, %v1660_v27  ;;  %v1729_v55 = vld [vmem:[%s3169_s4] sm:$0xff]  ;;  %v1732_v8 = vld [vmem:[%s3169_s4 + $0x18] sm:$0xff] }
 0x3b3   : > { %v1736_v7 = vld [vmem:[%s3169_s4 + $0x38] sm:$0xff] }
 0x3b4   : > { %v1596_v11 = vadd.f32 %v1588_v28, %v914_v29  ;;  %v1602_v45 = vmax.f32 %v1594_v30, 0.0 }
 0x3b6   : > { %v1604_v34 = vmax.f32 %v1596_v11, 0.0  ;;  %v1659_v54 = vmul.f32 %v1634_v20, %v1602_v45  ;;  %v1733_v11 = vld [vmem:[%s3169_s4 + $0x20] sm:$0xff] }
 0x3b7   : > { %v1521_v4 = vpop.f32.mrf.mxu3 }
 0x3b8   : > { %v1533_v21 = vadd.f32 %v1521_v4, %v1329_v36  ;;  %v1661_v47 = vmul.f32 %v3044_v6, %v1604_v34  ;;  %v1658_v6 = vmul.f32 %v1629_v18, %v1601_v50  ;;  %v1716_v36 = vadd.f32 %v1691_v3, %v1659_v54  ;;  %v3188_v34 = vld [vmem:[#allocation5_spill] sm:$0xff]  ;;  %v3189_v3 = vld [vmem:[#allocation6_spill] sm:$0xff] }
 0x3b9   : > { %v1725_v4 = vmax.f32 %v1717_v15, 0.0 }
 0x3ba   : > { %v1589_v53 = vadd.f32 %v1576_v17, %v1533_v21  ;;  %v1528_v17 = vadd.f32 %v1506_v61, %v1314_v13  ;;  %v1591_v61 = vadd.f32 %v1583_v32, %v899_v43  ;;  %v3187_v13 = vld [vmem:[#allocation15_spill] sm:$0xff]  ;;  %v1715_v9 = vadd.f32 %v1686_v62, %v1658_v6  ;;  %v1681_v21 = vpop.permute.xlu2 %1680  ;;  %v3191_v62 = vld [vmem:[#allocation8_spill] sm:$0xff] }
 0x3bb   : > { %v1718_v49 = vadd.f32 %v3187_v13, %v1661_v47 }
 0x3bc   : > { %v1597_v44 = vadd.f32 %v1589_v53, %v917_v46  ;;  %v1584_v53 = vadd.f32 %v1551_v35, %v1528_v17  ;;  %v1599_v29 = vmax.f32 %v1591_v61, 0.0  ;;  %v1723_v20 = vmax.f32 %v1715_v9, 0.0  ;;  %v1731_v17 = vld [vmem:[%s3169_s4 + $0x10] sm:$0xff] }
 0x3bd   : > { %v1726_v24 = vmax.f32 %v1718_v49, 0.0  ;;  %v3190_v61 = vld [vmem:[#allocation7_spill] sm:$0xff] }
 0x3be   : > { %v1605_v57 = vmax.f32 %v1597_v44, 0.0  ;;  %v1592_v5 = vadd.f32 %v1584_v53, %v902_v52  ;;  %v929_v50 = vadd.f32 %v3190_v61, %v589_v2 }
 0x3bf   : > { %v1524_v48 = vpop.f32.mrf.mxu3 }
 0x3c0   : > { %v1534_v60 = vadd.f32 %v1524_v48, %v1332_v58  ;;  %v1662_v25 = vmul.f32 %v3040_v19, %v1605_v57  ;;  %v1600_v19 = vmax.f32 %v1592_v5, 0.0  ;;  %v1724_v58 = vmax.f32 %v1716_v36, 0.0  ;;  %v1730_v48 = vld [vmem:[%s3169_s4 + $0x8] sm:$0xff]  ;;  %v604_v57 = vpop.permute.xlu1 %603 }
 0x3c2   : > { %v1590_v46 = vadd.f32 %v3036_v26, %v1534_v60  ;;  %v1719_v51 = vadd.f32 %v3185_v1, %v1662_v25  ;;  %v1657_v38 = vmul.f32 %v1624_v42, %v1600_v19  ;;  %v1734_v60 = vld [vmem:[%s3169_s4 + $0x28] sm:$0xff]  ;;  %v584_v22 = vpop.permute.xlu2 %583 }
 0x3c3   : > { %v926_v43 = vadd.f32 %v3189_v3, %v584_v22 }
 0x3c4   : > { %v1598_v28 = vadd.f32 %v1590_v46, %v920_v10  ;;  %v1714_v37 = vadd.f32 %v1681_v21, %v1657_v38  ;;  %v1735_v10 = vld [vmem:[%s3169_s4 + $0x30] sm:$0xff] }
 0x3c6   : > { %v1606_v56 = vmax.f32 %v1598_v28, 0.0  ;;  %v1722_v44 = vmax.f32 %v1714_v37, 0.0 }
 0x3c8   : > { %v1663_v26 = vmul.f32 %v3038_v39, %v1606_v56  ;;  %v1727_v39 = vmax.f32 %v1719_v51, 0.0  ;;  %v1749_v53 = vpop.permute.xlu1 %1748 }
 0x3ca   : > { %v1720_v41 = vadd.f32 %v3042_v12, %v1663_v26  ;;  %v1619_v12 = vpop.permute.xlu0 %1618  ;;  %v599_v46 = vpop.permute.xlu2 %598 }
 0x3cb   : > { %v1656_v14 = vmul.f32 %v1619_v12, %v1599_v29 }
 0x3cc   : > { %v1728_v35 = vmax.f32 %v1720_v41, 0.0 }
 0x3cd   : > { %v1713_v31 = vadd.f32 %v1676_v63, %v1656_v14 }
 0x3ce   : > { %1819 = vmatpush.msra.mxu3 %v1728_v35 }
 0x3cf   : > { %v1721_v59 = vmax.f32 %v1713_v31, 0.0 }
 0x3d0   : > { %1820 = vmatpush.msra.mxu3 %v1727_v39  ;;  %v1764_v33 = vpop.permute.xlu1 %1763  ;;  %v3192_v39 = vld [vmem:[#allocation9_spill] sm:$0xff] }
 0x3d1   : > { %v935_v15 = vadd.f32 %v3192_v39, %v599_v46 }
 0x3d2   : > { %1821 = vmatpush.msra.mxu3 %v1726_v24  ;;  %v579_v18 = vpop.permute.xlu0 %578  ;;  %v614_v23 = vpop.permute.xlu2 %613 }
 0x3d3   : > { %v923_v28 = vadd.f32 %v3188_v34, %v579_v18 }
 0x3d4   : > { %1822 = vmatpush.msra.mxu3 %v1725_v4  ;;  %v3193_v4 = vld [vmem:[#allocation10_spill] sm:$0xff] }
 0x3d5   : > { %v938_v9 = vadd.f32 %v3193_v4, %v604_v57 }
 0x3d6   : > { %1823 = vmatpush.msra.mxu3 %v1724_v58 }
 0x3d8   : > { %1824 = vmatpush.msra.mxu3 %v1723_v20  ;;  %v1779_v37 = vpop.permute.xlu1 %1778  ;;  %v3194_v20 = vld [vmem:[#allocation11_spill] sm:$0xff] }
 0x3da   : > { %1825 = vmatpush.msra.mxu3 %v1722_v44  ;;  %v594_v40 = vpop.permute.xlu0 %593  ;;  %v1759_v47 = vpop.permute.xlu2 %1758 }
 0x3db   : > { %v932_v19 = vadd.f32 %v3191_v62, %v594_v40 }
 0x3dc   : > { %1826 = vmatpush.msra.mxu3 %v1721_v59 }
 0x3dd   : > { %2079 = vmatmul.msk.f32.vlgmr.msra.gmra.mxu3 %vm1786_vm0, %v1729_v55 }
 0x3e2   : > { %v609_v0 = vpop.permute.xlu0 %608  ;;  %v1774_v38 = vpop.permute.xlu2 %1773 }
 0x3e3   : > { %v941_v31 = vadd.f32 %v3194_v20, %v609_v0 }
 0x3e5   : > { %2080 = vmatmul.msk.f32.gmra.mxu3 %vm1786_vm0, %v1730_v48 }
 0x3ea   : > { %v1754_v56 = vpop.permute.xlu0 %1753 }
 0x3ed   : > { %2081 = vmatmul.msk.f32.gmra.mxu3 %vm1786_vm0, %v1731_v17 }
 0x3f2   : > { %v1769_v54 = vpop.permute.xlu0 %1768 }
 0x3f5   : > { %2082 = vmatmul.msk.f32.gmra.mxu3 %vm1786_vm0, %v1732_v8  ;;  %v3195_v8 = vld [vmem:[#allocation12_spill] sm:$0xff] }
 0x3fa   : > { %v1784_v48 = vpop.permute.xlu0 %1783 }
 0x3fd   : > { %2083 = vmatmul.msk.f32.gmra.mxu3 %vm1786_vm0, %v1733_v11  ;;  %v944_v11 = vadd.f32 %v3195_v8, %v614_v23 }
 0x405   : > { %2084 = vmatmul.msk.f32.gmra.mxu3 %vm1786_vm0, %v1734_v60 }
 0x40d   : > { %2085 = vmatmul.msk.f32.gmra.mxu3 %vm1786_vm0, %v1735_v10 }
 0x415   : > { %2086 = vmatmul.msk.f32.gmra.mxu3 %vm1786_vm0, %v1736_v7 }
 0x460   : > { %v1828_v30 = vpop.f32.mrf.mxu3 }
 0x461   : > { %v1829_v52 = vadd.f32 %v1828_v30, %v1749_v53 }
 0x463   : > { %v1852_v32 = vadd.f32 %v1829_v52, %v923_v28 }
 0x465   : > { %v1860_v16 = vmax.f32 %v1852_v32, 0.0 }
 0x467   : > { %1868 = vst.msk [vmem:[%s3106_s28] sm:$0xff] %vm1016_vm1, %v1860_v16 }
 0x468   : > { %v1831_v25 = vpop.f32.mrf.mxu3 }
 0x469   : > { %v1832_v5 = vadd.f32 %v1831_v25, %v1754_v56 }
 0x46b   : > { %v1853_v45 = vadd.f32 %v1832_v5, %v926_v43 }
 0x46d   : > { %v1861_v26 = vmax.f32 %v1853_v45, 0.0 }
 0x46f   : > { %1869 = vst.msk [vmem:[%s3106_s28 + $0x8] sm:$0xff] %vm1016_vm1, %v1861_v26 }
 0x470   : > { %v1834_v42 = vpop.f32.mrf.mxu3 }
 0x471   : > { %v1835_v41 = vadd.f32 %v1834_v42, %v1759_v47 }
 0x473   : > { %v1854_v1 = vadd.f32 %v1835_v41, %v929_v50 }
 0x475   : > { %v1862_v51 = vmax.f32 %v1854_v1, 0.0 }
 0x477   : > { %1870 = vst.msk [vmem:[%s3106_s28 + $0x10] sm:$0xff] %vm1016_vm1, %v1862_v51 }
 0x478   : > { %v1837_v27 = vpop.f32.mrf.mxu3 }
 0x479   : > { %v1838_v35 = vadd.f32 %v1837_v27, %v1764_v33 }
 0x47b   : > { %v1855_v13 = vadd.f32 %v1838_v35, %v932_v19 }
 0x47d   : > { %v1863_v49 = vmax.f32 %v1855_v13, 0.0 }
 0x47f   : > { %1871 = vst.msk [vmem:[%s3106_s28 + $0x18] sm:$0xff] %vm1016_vm1, %v1863_v49 }
 0x480   : > { %v1840_v29 = vpop.f32.mrf.mxu3 }
 0x481   : > { %v1841_v6 = vadd.f32 %v1840_v29, %v1769_v54 }
 0x483   : > { %v1856_v24 = vadd.f32 %v1841_v6, %v935_v15 }
 0x485   : > { %v1864_v36 = vmax.f32 %v1856_v24, 0.0 }
 0x487   : > { %1872 = vst.msk [vmem:[%s3106_s28 + $0x20] sm:$0xff] %vm1016_vm1, %v1864_v36 }
 0x488   : > { %v1843_v12 = vpop.f32.mrf.mxu3 }
 0x489   : > { %v1844_v14 = vadd.f32 %v1843_v12, %v1774_v38 }
 0x48b   : > { %v1857_v21 = vadd.f32 %v1844_v14, %v938_v9 }
 0x48d   : > { %v1865_v58 = vmax.f32 %v1857_v21, 0.0 }
 0x48f   : > { %1873 = vst.msk [vmem:[%s3106_s28 + $0x28] sm:$0xff] %vm1016_vm1, %v1865_v58 }
 0x490   : > { %v1846_v63 = vpop.f32.mrf.mxu3 }
 0x491   : > { %v1847_v44 = vadd.f32 %v1846_v63, %v1779_v37 }
 0x493   : > { %v1858_v59 = vadd.f32 %v1847_v44, %v941_v31 }
 0x495   : > { %v1866_v55 = vmax.f32 %v1858_v59, 0.0 }
 0x497   : > { %1874 = vst.msk [vmem:[%s3106_s28 + $0x30] sm:$0xff] %vm1016_vm1, %v1866_v55 }
 0x498   : > { %v1849_v17 = vpop.f32.mrf.mxu3 }
 0x499   : > { %v1850_v60 = vadd.f32 %v1849_v17, %v1784_v48 }
 0x49b   : > { %v1859_v10 = vadd.f32 %v1850_v60, %v944_v11 }
 0x49d   : > { %v1867_v7 = vmax.f32 %v1859_v10, 0.0 }
 0x49f   : > { %1875 = vst.msk [vmem:[%s3106_s28 + $0x38] sm:$0xff] %vm1016_vm1, %v1867_v7 }
 0x4a0   : > { %2198 = shalt.err (!%p2195_p3)
}
 0x4a1   : > { %s2236_s20 = smov 128   ;;  %s2237_s28 = smov 8  }
 0x4a2   : > { %2101 = dma.vmem_to_hbm [thread:$0]  (%p2311_p5), %s1890_s12, 1024, %s1892_s13, %s1877_s25, %s2236_s20, %s2236_s20, %s2237_s28  }
 0x4a3 PF: > { %p2107_p4 = scmp.ge.s32.totalorder %s2233_s24, 2  ;;  %s1906_s29 = sand.u32 1, %s2221_s21  }
 0x4a4   : > { %s1907_s9 = scalar_lea.sflag [#allocation3], %s1906_s29 }
 0x4a5   : > { %p2104_p7 = pnand %p2107_p4, %p2315_p6 }
 0x4a7   : > { %p2105_p8 = pneg %p2104_p7 }
 0x4a9   : > { %2216 = dma.done.wait (%p2105_p8), %s1907_s9, 1024  }
 0x4aa   : > { %2218 = vsyncadd (%p2105_p8), %s1907_s9, 4294966272  ;;  %p16_p9 = scmp.ge.s32.totalorder %s2298_s27, 4   ;;  %s3196_s21 = smov %s2225_s22 }
 0x4ab   : > { %s3197_s22 = smov %s2229_s23  ;;  %s3198_s23 = smov %s2309_s30 }
 0x4ac   : > { %s3199_s24 = smov %s2298_s27  ;;  %18 = sbr.rel (!%p16_p9) target bundleno = 3 (0x3), region = 84 }
 0x4b1   :  { %1913 = vsyncpa [#allocation3], 1 }
 0x4b2   :  { %1915 = vsyncpa [#allocation3 + $0x1], 1 }

</bundles_post_ra>
